<compile_context>
chip_gen: v7x
topology: tpu7x:2x2x1
jax: 0.10.0
libtpu: 0.0.40
codegen_flags: <defaults>
</compile_context>

<pallas_src>
import math

import jax
import jax.numpy as jnp
from jax.experimental import pallas as pl
from jax.experimental.pallas import tpu as pltpu

# ----------------------------- model config ---------------------------------
B = 2          # batch
S = 8          # sequence length
T = B * S      # total tokens (batch folded into one activation slab)
H = 32         # hidden size
NH = 2         # attention heads
HD = H // NH   # head dim
F = 64         # FFN intermediate size
V = 128        # vocab size
NLAYERS = 2
LN_EPS = 1e-12  # BERT layernorm eps
LANES = 128     # lane-dense blob width

# ----------------------- packed-blob row offsets ------------------------------
# Weight blob (bf16, width 128): row-packed matmul operands.
W_OH = 0                      # one-hot ids           (T, V)
W_EMB = W_OH + T              # word embedding table  (V, H)
W_L0 = W_EMB + V              # first layer base
W_QKV = 0                     # fused [wq|wk|wv]      (H, 3H)
W_WO = H                      # output projection     (H, H)
W_W1 = 2 * H                  # FFN in                (H, F)
W_W2 = 3 * H                  # FFN out               (F, H)
W_LSTRIDE = 3 * H + F         # rows per layer (all offsets 16-aligned for bf16 tiles)
W_ROWS = W_L0 + NLAYERS * W_LSTRIDE

# Metadata blob (f32, width 128): biases / LN params / masks / pooling matrix.
M_POS = 0                     # tiled position embeddings (T, H)
M_BIAS = M_POS + T            # additive attention bias   (T, T)
M_POOL = M_BIAS + T           # mean-pooling matrix       (B, T)
M_ELNG = M_POOL + B           # embedding LN gamma        (1, H)
M_ELNB = M_ELNG + 1           # embedding LN beta         (1, H)
M_L0 = M_ELNB + 1             # first layer base
(M_BQKV, M_BO, M_LN1G, M_LN1B, M_B1, M_B2, M_LN2G, M_LN2B) = range(8)
M_LSTRIDE = 8
M_ROWS = M_L0 + NLAYERS * M_LSTRIDE


# ----------------------------- shared math -----------------------------------
def _layernorm(x, gamma, beta):
    mu = jnp.mean(x, axis=-1, keepdims=True)
    var = jnp.mean((x - mu) ** 2, axis=-1, keepdims=True)
    return (x - mu) * jax.lax.rsqrt(var + LN_EPS) * gamma + beta


# ----------------------------- fused Pallas kernel ---------------------------
def fused_encoder_kernel(w_ref, m_ref, hid_ref, sent_ref):
    f32 = jnp.float32
    bf16 = jnp.bfloat16

    # ---- embedding: one-hot (exact 0/1 in bf16) @ bf16 table, one MXU push ---
    onehot = w_ref[W_OH:W_OH + T, :V]                       # (T, V) bf16
    wemb = w_ref[W_EMB:W_EMB + V, :H]                       # (V, H) bf16
    x = jnp.dot(onehot, wemb, preferred_element_type=f32)   # (T, H) f32, exact
    x = x + m_ref[M_POS:M_POS + T, :H]
    x = _layernorm(x, m_ref[M_ELNG:M_ELNG + 1, :H], m_ref[M_ELNB:M_ELNB + 1, :H])
    hid_ref[0] = x

    bias = m_ref[M_BIAS:M_BIAS + T, :T]                     # (T, T) additive mask
    scale = 1.0 / math.sqrt(HD)

    # Static unroll over layers; all weights resident in VMEM for the whole call.
    for l in range(NLAYERS):
        wb = W_L0 + l * W_LSTRIDE
        mb = M_L0 + l * M_LSTRIDE

        # ---- fused QKV: one bf16 matmul per layer ----
        qkv = jnp.dot(x.astype(bf16), w_ref[wb + W_QKV:wb + W_QKV + H, :3 * H],
                      preferred_element_type=f32)           # (T, 3H)
        qkv = qkv + m_ref[mb + M_BQKV:mb + M_BQKV + 1, :3 * H]

        # ---- per-head attention on static lane slices of the fused result ----
        ctx_heads = []
        for h in range(NH):
            q = qkv[:, h * HD:(h + 1) * HD]
            k = qkv[:, H + h * HD:H + (h + 1) * HD]
            v = qkv[:, 2 * H + h * HD:2 * H + (h + 1) * HD]
            # q @ k^T without an explicit transpose: contract the last dims.
            s = jax.lax.dot_general(q.astype(bf16), k.astype(bf16),
                                    (((1,), (1,)), ((), ())),
                                    preferred_element_type=f32)
            s = s * scale + bias
            s = s - jnp.max(s, axis=-1, keepdims=True)
            p = jnp.exp(s)
            p = p / jnp.sum(p, axis=-1, keepdims=True)       # exact softmax norm
            ctx_heads.append(jnp.dot(p.astype(bf16), v.astype(bf16),
                                     preferred_element_type=f32))   # (T, HD)
        ctx_all = jnp.concatenate(ctx_heads, axis=-1)        # (T, H)

        # ---- single output projection with the full (H, H) wo ----
        attn = jnp.dot(ctx_all.astype(bf16), w_ref[wb + W_WO:wb + W_WO + H, :H],
                       preferred_element_type=f32)
        attn = attn + m_ref[mb + M_BO:mb + M_BO + 1, :H]
        h1 = _layernorm(x + attn,
                        m_ref[mb + M_LN1G:mb + M_LN1G + 1, :H],
                        m_ref[mb + M_LN1B:mb + M_LN1B + 1, :H])

        # ---- feed forward ----
        ff = jnp.dot(h1.astype(bf16), w_ref[wb + W_W1:wb + W_W1 + H, :F],
                     preferred_element_type=f32)
        ff = ff + m_ref[mb + M_B1:mb + M_B1 + 1, :F]
        ff = jax.nn.gelu(ff, approximate=True)               # tanh GELU (EUP)
        ff = jnp.dot(ff.astype(bf16), w_ref[wb + W_W2:wb + W_W2 + F, :H],
                     preferred_element_type=f32)
        ff = ff + m_ref[mb + M_B2:mb + M_B2 + 1, :H]
        x = _layernorm(h1 + ff,
                       m_ref[mb + M_LN2G:mb + M_LN2G + 1, :H],
                       m_ref[mb + M_LN2B:mb + M_LN2B + 1, :H])
        hid_ref[l + 1] = x

    # ---- masked mean pooling: one small matmul with the pooling matrix ----
    sent_ref[...] = jnp.dot(m_ref[M_POOL:M_POOL + B, :T], x,
                            preferred_element_type=f32)


def run_fused_encoder(w_blob, m_blob):
    # Grid-less call: both packed blobs are whole-array VMEM blocks, so the
    # entire forward pass is one kernel invocation with exactly 2 input DMAs.
    vmem_spec = pl.BlockSpec(memory_space=pltpu.MemorySpace.VMEM)
    hid, sent = pl.pallas_call(
        fused_encoder_kernel,
        out_shape=(jax.ShapeDtypeStruct((NLAYERS + 1, T, H), jnp.float32),
                   jax.ShapeDtypeStruct((B, H), jnp.float32)),
        in_specs=[vmem_spec, vmem_spec],
        out_specs=(vmem_spec, vmem_spec),
        compiler_params=pltpu.CompilerParams(
            vmem_limit_bytes=8 * 1024 * 1024),   # generous headroom over ~200 KiB
    )(w_blob, m_blob)
    return hid, sent


# ----------------------------- parameter init --------------------------------
def init_params(key):
    def nrm_mm(k, shape, scale=0.02):
        # Matmul weights: round to bf16-representable values so the bf16 MXU
        # path and the f32 reference use identical weights.
        w = scale * jax.random.normal(k, shape, dtype=jnp.float32)
        return w.astype(jnp.bfloat16).astype(jnp.float32)

    def nrm_f32(k, shape, scale=0.02):
        return scale * jax.random.normal(k, shape, dtype=jnp.float32)

    keys = jax.random.split(key, 16)
    L = NLAYERS
    return {
        "word_emb": nrm_mm(keys[0], (V, H)),
        "pos_emb": nrm_f32(keys[1], (S, H)),
        "emb_ln_g": 1.0 + nrm_f32(keys[8], (H,), 0.05),
        "emb_ln_b": nrm_f32(keys[9], (H,), 0.02),
        "layers": {
            "wq": nrm_mm(keys[2], (L, H, H)),
            "wk": nrm_mm(keys[3], (L, H, H)),
            "wv": nrm_mm(keys[4], (L, H, H)),
            "wo": nrm_mm(keys[5], (L, H, H)),
            "bq": nrm_f32(keys[10], (L, H)),
            "bk": nrm_f32(keys[11], (L, H)),
            "bv": nrm_f32(keys[12], (L, H)),
            "bo": nrm_f32(keys[13], (L, H)),
            "ln1g": 1.0 + nrm_f32(keys[14], (L, H), 0.05),
            "ln1b": nrm_f32(keys[15], (L, H), 0.02),
            "w1": nrm_mm(keys[6], (L, H, F)),
            "b1": nrm_f32(keys[10], (L, F)),
            "w2": nrm_mm(keys[7], (L, F, H)),
            "b2": nrm_f32(keys[11], (L, H)),
            "ln2g": 1.0 + nrm_f32(keys[12], (L, H), 0.05),
            "ln2b": nrm_f32(keys[13], (L, H), 0.02),
        },
    }


# ----------------------------- blob packing ----------------------------------
def _pad_lanes(m):
    return jnp.pad(m, ((0, 0), (0, LANES - m.shape[1])))


def _row(v):
    return _pad_lanes(v.reshape(1, -1))


# ----------------------------- forward (Transformer.forward) -----------------
@jax.jit
def transformer_forward(params, input_ids, attention_mask):
    """Mirrors Transformer.forward: token_embeddings, cls_token_embeddings,
    all_layer_embeddings and (mean-pooled) sentence_embedding."""
    lp = params["layers"]

    # ---- bf16 weight blob: one-hot ids + all matmul weights, lane width 128 ----
    onehot = jax.nn.one_hot(input_ids.reshape(T), V, dtype=jnp.float32)  # (T, V)
    w_rows = [_pad_lanes(onehot), _pad_lanes(params["word_emb"])]
    for l in range(NLAYERS):
        wqkv = jnp.concatenate([lp["wq"][l], lp["wk"][l], lp["wv"][l]], axis=1)
        w_rows += [_pad_lanes(wqkv), _pad_lanes(lp["wo"][l]),
                   _pad_lanes(lp["w1"][l]), _pad_lanes(lp["w2"][l])]
    w_blob = jnp.concatenate(w_rows, axis=0).astype(jnp.bfloat16)
    assert w_blob.shape == (W_ROWS, LANES)

    # ---- f32 metadata blob: pos emb, masks, pooling matrix, biases, LN params ----
    maskf = attention_mask.astype(jnp.float32)                  # (B, S)
    mask_flat = maskf.reshape(T)
    batch_id = jnp.arange(T, dtype=jnp.int32) // S
    same_batch = batch_id[:, None] == batch_id[None, :]
    allowed = same_batch & (mask_flat[None, :] > 0.5)
    bias = jnp.where(allowed, 0.0, -1e9).astype(jnp.float32)    # (T, T)

    inv_count = 1.0 / jnp.maximum(jnp.sum(maskf, axis=1), 1e-9)
    batch_sel = (batch_id[None, :] == jnp.arange(B, dtype=jnp.int32)[:, None])
    pool_mat = batch_sel.astype(jnp.float32) * mask_flat[None, :] * inv_count[:, None]

    pos_tiled = jnp.tile(params["pos_emb"], (B, 1))             # (T, H)

    m_rows = [_pad_lanes(pos_tiled), _pad_lanes(bias), _pad_lanes(pool_mat),
              _row(params["emb_ln_g"]), _row(params["emb_ln_b"])]
    for l in range(NLAYERS):
        bqkv = jnp.concatenate([lp["bq"][l], lp["bk"][l], lp["bv"][l]], axis=0)
        m_rows += [_row(bqkv), _row(lp["bo"][l]),
                   _row(lp["ln1g"][l]), _row(lp["ln1b"][l]),
                   _row(lp["b1"][l]), _row(lp["b2"][l]),
                   _row(lp["ln2g"][l]), _row(lp["ln2b"][l])]
    m_blob = jnp.concatenate(m_rows, axis=0).astype(jnp.float32)
    assert m_blob.shape == (M_ROWS, LANES)

    hid, sent = run_fused_encoder(w_blob, m_blob)

    hid4 = hid.reshape(NLAYERS + 1, B, S, H)
    token_embeddings = hid4[-1]
    return {
        "token_embeddings": token_embeddings,
        "cls_token_embeddings": token_embeddings[:, 0, :],
        "attention_mask": attention_mask,
        "all_layer_embeddings": [hid4[i] for i in range(NLAYERS + 1)],
        "sentence_embedding": sent,
    }


# ----------------------------- pure-JAX reference ----------------------------
def reference_forward(params, input_ids, attention_mask):
    lp = params["layers"]
    emb = jnp.take(params["word_emb"], input_ids, axis=0) + params["pos_emb"][None]
    x = _layernorm(emb, params["emb_ln_g"], params["emb_ln_b"])
    maskf = attention_mask.astype(jnp.float32)
    key_bias = (maskf[:, None, None, :] - 1.0) * 1e9            # (B,1,1,S)
    for l in range(NLAYERS):
        q = x @ lp["wq"][l] + lp["bq"][l]
        k = x @ lp["wk"][l] + lp["bk"][l]
        v = x @ lp["wv"][l] + lp["bv"][l]
        qh = q.reshape(B, S, NH, HD).transpose(0, 2, 1, 3)
        kh = k.reshape(B, S, NH, HD).transpose(0, 2, 1, 3)
        vh = v.reshape(B, S, NH, HD).transpose(0, 2, 1, 3)
        s = jnp.einsum("bnqd,bnkd->bnqk", qh, kh) / math.sqrt(HD) + key_bias
        p = jax.nn.softmax(s, axis=-1)
        ctx = jnp.einsum("bnqk,bnkd->bnqd", p, vh)
        ctx = ctx.transpose(0, 2, 1, 3).reshape(B, S, H)
        attn = ctx @ lp["wo"][l] + lp["bo"][l]
        h1 = _layernorm(x + attn, lp["ln1g"][l], lp["ln1b"][l])
        ff = jax.nn.gelu(h1 @ lp["w1"][l] + lp["b1"][l], approximate=True)
        ff = ff @ lp["w2"][l] + lp["b2"][l]
        x = _layernorm(h1 + ff, lp["ln2g"][l], lp["ln2b"][l])
    denom = jnp.maximum(jnp.sum(maskf, axis=1, keepdims=True), 1e-9)
    sent = jnp.sum(x * maskf[..., None], axis=1) / denom
    return x, sent


# ----------------------------- main -------------------------------------------
if __name__ == "__main__":
    key = jax.random.PRNGKey(0)
    pkey, ikey = jax.random.split(key)
    params = init_params(pkey)

    input_ids = jax.random.randint(ikey, (B, S), 0, V, dtype=jnp.int32)
    # second sentence padded: last 3 positions masked out
    attention_mask = jnp.array(
        [[1] * S,
         [1] * (S - 3) + [0] * 3], dtype=jnp.int32)

    features = transformer_forward(params, input_ids, attention_mask)
    jax.block_until_ready(features["sentence_embedding"])
    jax.block_until_ready(features["token_embeddings"])

    assert features["token_embeddings"].shape == (B, S, H)
    assert features["cls_token_embeddings"].shape == (B, H)
    assert features["sentence_embedding"].shape == (B, H)
    assert len(features["all_layer_embeddings"]) == NLAYERS + 1

    # numerical sanity check vs a pure-f32 JAX reference; tolerance covers the
    # intentional bf16 cast of activations at each MXU operand.
    ref_tok, ref_sent = reference_forward(params, input_ids, attention_mask)
    tok_err = float(jnp.max(jnp.abs(features["token_embeddings"] - ref_tok)))
    sent_err = float(jnp.max(jnp.abs(features["sentence_embedding"] - ref_sent)))
    assert jnp.allclose(features["token_embeddings"], ref_tok,
                        atol=5e-2, rtol=5e-2), tok_err
    assert jnp.allclose(features["sentence_embedding"], ref_sent,
                        atol=5e-2, rtol=5e-2), sent_err
    assert jnp.allclose(features["cls_token_embeddings"], ref_tok[:, 0, :],
                        atol=5e-2, rtol=5e-2)

    print("KERNEL_OK")
</pallas_src>

<mosaic_0001>
module attributes {stable_mosaic.version = 11 : i64} {
  func.func @fused_encoder_kernel(%arg0: memref<464x128xbf16, #tpu.memory_space<vmem>>, %arg1: memref<52x128xf32, #tpu.memory_space<vmem>>, %arg2: memref<3x16x32xf32, #tpu.memory_space<vmem>>, %arg3: memref<2x32xf32, #tpu.memory_space<vmem>>) attributes {dimension_semantics = [], scalar_prefetch = 0 : i64, scratch_operands = 0 : i64, tpu.core_type = #tpu.core_type<tc>} {
    %c0 = arith.constant 0 : index
    %c0_0 = arith.constant 0 : index
    %0 = vector.load %arg0[%c0, %c0_0] : memref<464x128xbf16, #tpu.memory_space<vmem>>, vector<16x128xbf16>
    %c16 = arith.constant 16 : index
    %c0_1 = arith.constant 0 : index
    %1 = vector.load %arg0[%c16, %c0_1] : memref<464x128xbf16, #tpu.memory_space<vmem>>, vector<128x32xbf16>
    %cst = arith.constant dense<0.000000e+00> : vector<16x32xf32>
    %2 = tpu.matmul %0, %1, %cst {dimension_numbers = #tpu.dot_dimension_numbers<[1], [0], [0], [1], [0, 0, 1, 1], [], []>} : vector<16x128xbf16>, vector<128x32xbf16>, vector<16x32xf32> -> vector<16x32xf32>
    %c0_2 = arith.constant 0 : index
    %c0_3 = arith.constant 0 : index
    %3 = vector.load %arg1[%c0_2, %c0_3] : memref<52x128xf32, #tpu.memory_space<vmem>>, vector<16x32xf32>
    %4 = arith.addf %2, %3 : vector<16x32xf32>
    %c34 = arith.constant 34 : index
    %c0_4 = arith.constant 0 : index
    %5 = vector.load %arg1[%c34, %c0_4] : memref<52x128xf32, #tpu.memory_space<vmem>>, vector<1x32xf32>
    %c35 = arith.constant 35 : index
    %c0_5 = arith.constant 0 : index
    %6 = vector.load %arg1[%c35, %c0_5] : memref<52x128xf32, #tpu.memory_space<vmem>>, vector<1x32xf32>
    %cst_6 = arith.constant dense<0.000000e+00> : vector<16xf32>
    %7 = vector.multi_reduction <add>, %4, %cst_6 [1] : vector<16x32xf32> to vector<16xf32>
    %8 = vector.shape_cast %7 : vector<16xf32> to vector<16x1xf32>
    %cst_7 = arith.constant 3.200000e+01 : f32
    %9 = vector.broadcast %cst_7 : f32 to vector<16x1xf32>
    %10 = arith.divf %8, %9 : vector<16x1xf32>
    %11 = vector.broadcast %10 : vector<16x1xf32> to vector<16x32xf32>
    %12 = arith.subf %4, %11 : vector<16x32xf32>
    %13 = arith.mulf %12, %12 : vector<16x32xf32>
    %cst_8 = arith.constant dense<0.000000e+00> : vector<16xf32>
    %14 = vector.multi_reduction <add>, %13, %cst_8 [1] : vector<16x32xf32> to vector<16xf32>
    %15 = vector.shape_cast %14 : vector<16xf32> to vector<16x1xf32>
    %cst_9 = arith.constant 3.200000e+01 : f32
    %16 = vector.broadcast %cst_9 : f32 to vector<16x1xf32>
    %17 = arith.divf %15, %16 : vector<16x1xf32>
    %18 = vector.broadcast %10 : vector<16x1xf32> to vector<16x32xf32>
    %19 = arith.subf %4, %18 : vector<16x32xf32>
    %cst_10 = arith.constant 9.99999996E-13 : f32
    %20 = vector.broadcast %cst_10 : f32 to vector<16x1xf32>
    %21 = arith.addf %17, %20 : vector<16x1xf32>
    %22 = math.rsqrt %21 : vector<16x1xf32>
    %23 = vector.broadcast %22 : vector<16x1xf32> to vector<16x32xf32>
    %24 = arith.mulf %19, %23 : vector<16x32xf32>
    %25 = vector.broadcast %5 : vector<1x32xf32> to vector<16x32xf32>
    %26 = arith.mulf %24, %25 : vector<16x32xf32>
    %27 = vector.broadcast %6 : vector<1x32xf32> to vector<16x32xf32>
    %28 = arith.addf %26, %27 : vector<16x32xf32>
    %c0_11 = arith.constant 0 : index
    %c0_12 = arith.constant 0 : index
    %c0_13 = arith.constant 0 : index
    %29 = vector.load %arg2[%c0_11, %c0_12, %c0_13] : memref<3x16x32xf32, #tpu.memory_space<vmem>>, vector<1x16x32xf32>
    %30 = vector.shape_cast %29 : vector<1x16x32xf32> to vector<16x32xf32>
    %31 = vector.shape_cast %28 : vector<16x32xf32> to vector<1x16x32xf32>
    tpu.vector_store %arg2[%c0_11, %c0_12, %c0_13], %31 {strides = array<i32>} : memref<3x16x32xf32, #tpu.memory_space<vmem>>, vector<1x16x32xf32>,
    %c16_14 = arith.constant 16 : index
    %c0_15 = arith.constant 0 : index
    %32 = vector.load %arg1[%c16_14, %c0_15] : memref<52x128xf32, #tpu.memory_space<vmem>>, vector<16x16xf32>
    %33 = arith.truncf %28 : vector<16x32xf32> to vector<16x32xbf16>
    %c144 = arith.constant 144 : index
    %c0_16 = arith.constant 0 : index
    %34 = vector.load %arg0[%c144, %c0_16] : memref<464x128xbf16, #tpu.memory_space<vmem>>, vector<32x96xbf16>
    %cst_17 = arith.constant dense<0.000000e+00> : vector<16x96xf32>
    %35 = tpu.matmul %33, %34, %cst_17 {dimension_numbers = #tpu.dot_dimension_numbers<[1], [0], [0], [1], [0, 0, 1, 1], [], []>} : vector<16x32xbf16>, vector<32x96xbf16>, vector<16x96xf32> -> vector<16x96xf32>
    %c36 = arith.constant 36 : index
    %c0_18 = arith.constant 0 : index
    %36 = vector.load %arg1[%c36, %c0_18] : memref<52x128xf32, #tpu.memory_space<vmem>>, vector<1x96xf32>
    %37 = vector.broadcast %36 : vector<1x96xf32> to vector<16x96xf32>
    %38 = arith.addf %35, %37 : vector<16x96xf32>
    %39 = vector.extract_strided_slice %38 {offsets = [0, 0], sizes = [16, 16], strides = [1, 1]} : vector<16x96xf32> to vector<16x16xf32>
    %40 = vector.extract_strided_slice %38 {offsets = [0, 32], sizes = [16, 16], strides = [1, 1]} : vector<16x96xf32> to vector<16x16xf32>
    %41 = vector.extract_strided_slice %38 {offsets = [0, 64], sizes = [16, 16], strides = [1, 1]} : vector<16x96xf32> to vector<16x16xf32>
    %42 = arith.truncf %39 : vector<16x16xf32> to vector<16x16xbf16>
    %43 = arith.truncf %40 : vector<16x16xf32> to vector<16x16xbf16>
    %cst_19 = arith.constant dense<0.000000e+00> : vector<16x16xf32>
    %44 = tpu.matmul %42, %43, %cst_19 {dimension_numbers = #tpu.dot_dimension_numbers<[1], [1], [0], [0], [0, 0, 1, 0], [], []>} : vector<16x16xbf16>, vector<16x16xbf16>, vector<16x16xf32> -> vector<16x16xf32>
    %cst_20 = arith.constant 2.500000e-01 : f32
    %45 = vector.broadcast %cst_20 : f32 to vector<16x16xf32>
    %46 = arith.mulf %44, %45 : vector<16x16xf32>
    %47 = arith.addf %46, %32 : vector<16x16xf32>
    %cst_21 = arith.constant dense<0xFF800000> : vector<16xf32>
    %48 = vector.multi_reduction <maximumf>, %47, %cst_21 [1] : vector<16x16xf32> to vector<16xf32>
    %49 = vector.shape_cast %48 : vector<16xf32> to vector<16x1xf32>
    %50 = vector.broadcast %49 : vector<16x1xf32> to vector<16x16xf32>
    %51 = arith.subf %47, %50 : vector<16x16xf32>
    %52 = math.exp %51 : vector<16x16xf32>
    %cst_22 = arith.constant dense<0.000000e+00> : vector<16xf32>
    %53 = vector.multi_reduction <add>, %52, %cst_22 [1] : vector<16x16xf32> to vector<16xf32>
    %54 = vector.shape_cast %53 : vector<16xf32> to vector<16x1xf32>
    %55 = vector.broadcast %54 : vector<16x1xf32> to vector<16x16xf32>
    %56 = arith.divf %52, %55 : vector<16x16xf32>
    %57 = arith.truncf %56 : vector<16x16xf32> to vector<16x16xbf16>
    %58 = arith.truncf %41 : vector<16x16xf32> to vector<16x16xbf16>
    %cst_23 = arith.constant dense<0.000000e+00> : vector<16x16xf32>
    %59 = tpu.matmul %57, %58, %cst_23 {dimension_numbers = #tpu.dot_dimension_numbers<[1], [0], [0], [1], [0, 0, 1, 1], [], []>} : vector<16x16xbf16>, vector<16x16xbf16>, vector<16x16xf32> -> vector<16x16xf32>
    %60 = vector.extract_strided_slice %38 {offsets = [0, 16], sizes = [16, 16], strides = [1, 1]} : vector<16x96xf32> to vector<16x16xf32>
    %61 = vector.extract_strided_slice %38 {offsets = [0, 48], sizes = [16, 16], strides = [1, 1]} : vector<16x96xf32> to vector<16x16xf32>
    %62 = vector.extract_strided_slice %38 {offsets = [0, 80], sizes = [16, 16], strides = [1, 1]} : vector<16x96xf32> to vector<16x16xf32>
    %63 = arith.truncf %60 : vector<16x16xf32> to vector<16x16xbf16>
    %64 = arith.truncf %61 : vector<16x16xf32> to vector<16x16xbf16>
    %cst_24 = arith.constant dense<0.000000e+00> : vector<16x16xf32>
    %65 = tpu.matmul %63, %64, %cst_24 {dimension_numbers = #tpu.dot_dimension_numbers<[1], [1], [0], [0], [0, 0, 1, 0], [], []>} : vector<16x16xbf16>, vector<16x16xbf16>, vector<16x16xf32> -> vector<16x16xf32>
    %cst_25 = arith.constant 2.500000e-01 : f32
    %66 = vector.broadcast %cst_25 : f32 to vector<16x16xf32>
    %67 = arith.mulf %65, %66 : vector<16x16xf32>
    %68 = arith.addf %67, %32 : vector<16x16xf32>
    %cst_26 = arith.constant dense<0xFF800000> : vector<16xf32>
    %69 = vector.multi_reduction <maximumf>, %68, %cst_26 [1] : vector<16x16xf32> to vector<16xf32>
    %70 = vector.shape_cast %69 : vector<16xf32> to vector<16x1xf32>
    %71 = vector.broadcast %70 : vector<16x1xf32> to vector<16x16xf32>
    %72 = arith.subf %68, %71 : vector<16x16xf32>
    %73 = math.exp %72 : vector<16x16xf32>
    %cst_27 = arith.constant dense<0.000000e+00> : vector<16xf32>
    %74 = vector.multi_reduction <add>, %73, %cst_27 [1] : vector<16x16xf32> to vector<16xf32>
    %75 = vector.shape_cast %74 : vector<16xf32> to vector<16x1xf32>
    %76 = vector.broadcast %75 : vector<16x1xf32> to vector<16x16xf32>
    %77 = arith.divf %73, %76 : vector<16x16xf32>
    %78 = arith.truncf %77 : vector<16x16xf32> to vector<16x16xbf16>
    %79 = arith.truncf %62 : vector<16x16xf32> to vector<16x16xbf16>
    %cst_28 = arith.constant dense<0.000000e+00> : vector<16x16xf32>
    %80 = tpu.matmul %78, %79, %cst_28 {dimension_numbers = #tpu.dot_dimension_numbers<[1], [0], [0], [1], [0, 0, 1, 1], [], []>} : vector<16x16xbf16>, vector<16x16xbf16>, vector<16x16xf32> -> vector<16x16xf32>
    %81 = tpu.concatenate %59, %80 in 1 : vector<16x16xf32>, vector<16x16xf32> -> vector<16x32xf32>
    %82 = arith.truncf %81 : vector<16x32xf32> to vector<16x32xbf16>
    %c176 = arith.constant 176 : index
    %c0_29 = arith.constant 0 : index
    %83 = vector.load %arg0[%c176, %c0_29] : memref<464x128xbf16, #tpu.memory_space<vmem>>, vector<32x32xbf16>
    %cst_30 = arith.constant dense<0.000000e+00> : vector<16x32xf32>
    %84 = tpu.matmul %82, %83, %cst_30 {dimension_numbers = #tpu.dot_dimension_numbers<[1], [0], [0], [1], [0, 0, 1, 1], [], []>} : vector<16x32xbf16>, vector<32x32xbf16>, vector<16x32xf32> -> vector<16x32xf32>
    %c37 = arith.constant 37 : index
    %c0_31 = arith.constant 0 : index
    %85 = vector.load %arg1[%c37, %c0_31] : memref<52x128xf32, #tpu.memory_space<vmem>>, vector<1x32xf32>
    %86 = vector.broadcast %85 : vector<1x32xf32> to vector<16x32xf32>
    %87 = arith.addf %84, %86 : vector<16x32xf32>
    %88 = arith.addf %28, %87 : vector<16x32xf32>
    %c38 = arith.constant 38 : index
    %c0_32 = arith.constant 0 : index
    %89 = vector.load %arg1[%c38, %c0_32] : memref<52x128xf32, #tpu.memory_space<vmem>>, vector<1x32xf32>
    %c39 = arith.constant 39 : index
    %c0_33 = arith.constant 0 : index
    %90 = vector.load %arg1[%c39, %c0_33] : memref<52x128xf32, #tpu.memory_space<vmem>>, vector<1x32xf32>
    %cst_34 = arith.constant dense<0.000000e+00> : vector<16xf32>
    %91 = vector.multi_reduction <add>, %88, %cst_34 [1] : vector<16x32xf32> to vector<16xf32>
    %92 = vector.shape_cast %91 : vector<16xf32> to vector<16x1xf32>
    %cst_35 = arith.constant 3.200000e+01 : f32
    %93 = vector.broadcast %cst_35 : f32 to vector<16x1xf32>
    %94 = arith.divf %92, %93 : vector<16x1xf32>
    %95 = vector.broadcast %94 : vector<16x1xf32> to vector<16x32xf32>
    %96 = arith.subf %88, %95 : vector<16x32xf32>
    %97 = arith.mulf %96, %96 : vector<16x32xf32>
    %cst_36 = arith.constant dense<0.000000e+00> : vector<16xf32>
    %98 = vector.multi_reduction <add>, %97, %cst_36 [1] : vector<16x32xf32> to vector<16xf32>
    %99 = vector.shape_cast %98 : vector<16xf32> to vector<16x1xf32>
    %cst_37 = arith.constant 3.200000e+01 : f32
    %100 = vector.broadcast %cst_37 : f32 to vector<16x1xf32>
    %101 = arith.divf %99, %100 : vector<16x1xf32>
    %102 = vector.broadcast %94 : vector<16x1xf32> to vector<16x32xf32>
    %103 = arith.subf %88, %102 : vector<16x32xf32>
    %cst_38 = arith.constant 9.99999996E-13 : f32
    %104 = vector.broadcast %cst_38 : f32 to vector<16x1xf32>
    %105 = arith.addf %101, %104 : vector<16x1xf32>
    %106 = math.rsqrt %105 : vector<16x1xf32>
    %107 = vector.broadcast %106 : vector<16x1xf32> to vector<16x32xf32>
    %108 = arith.mulf %103, %107 : vector<16x32xf32>
    %109 = vector.broadcast %89 : vector<1x32xf32> to vector<16x32xf32>
    %110 = arith.mulf %108, %109 : vector<16x32xf32>
    %111 = vector.broadcast %90 : vector<1x32xf32> to vector<16x32xf32>
    %112 = arith.addf %110, %111 : vector<16x32xf32>
    %113 = arith.truncf %112 : vector<16x32xf32> to vector<16x32xbf16>
    %c208 = arith.constant 208 : index
    %c0_39 = arith.constant 0 : index
    %114 = vector.load %arg0[%c208, %c0_39] : memref<464x128xbf16, #tpu.memory_space<vmem>>, vector<32x64xbf16>
    %cst_40 = arith.constant dense<0.000000e+00> : vector<16x64xf32>
    %115 = tpu.matmul %113, %114, %cst_40 {dimension_numbers = #tpu.dot_dimension_numbers<[1], [0], [0], [1], [0, 0, 1, 1], [], []>} : vector<16x32xbf16>, vector<32x64xbf16>, vector<16x64xf32> -> vector<16x64xf32>
    %c40 = arith.constant 40 : index
    %c0_41 = arith.constant 0 : index
    %116 = vector.load %arg1[%c40, %c0_41] : memref<52x128xf32, #tpu.memory_space<vmem>>, vector<1x64xf32>
    %117 = vector.broadcast %116 : vector<1x64xf32> to vector<16x64xf32>
    %118 = arith.addf %115, %117 : vector<16x64xf32>
    %119 = arith.mulf %118, %118 : vector<16x64xf32>
    %120 = arith.mulf %118, %119 : vector<16x64xf32>
    %cst_42 = arith.constant 4.471500e-02 : f32
    %121 = vector.broadcast %cst_42 : f32 to vector<16x64xf32>
    %122 = arith.mulf %121, %120 : vector<16x64xf32>
    %123 = arith.addf %118, %122 : vector<16x64xf32>
    %cst_43 = arith.constant 0.797884583 : f32
    %124 = vector.broadcast %cst_43 : f32 to vector<16x64xf32>
    %125 = arith.mulf %124, %123 : vector<16x64xf32>
    %126 = math.tanh %125 : vector<16x64xf32>
    %cst_44 = arith.constant 1.000000e+00 : f32
    %127 = vector.broadcast %cst_44 : f32 to vector<16x64xf32>
    %128 = arith.addf %127, %126 : vector<16x64xf32>
    %cst_45 = arith.constant 5.000000e-01 : f32
    %129 = vector.broadcast %cst_45 : f32 to vector<16x64xf32>
    %130 = arith.mulf %129, %128 : vector<16x64xf32>
    %131 = arith.mulf %118, %130 : vector<16x64xf32>
    %132 = arith.truncf %131 : vector<16x64xf32> to vector<16x64xbf16>
    %c240 = arith.constant 240 : index
    %c0_46 = arith.constant 0 : index
    %133 = vector.load %arg0[%c240, %c0_46] : memref<464x128xbf16, #tpu.memory_space<vmem>>, vector<64x32xbf16>
    %cst_47 = arith.constant dense<0.000000e+00> : vector<16x32xf32>
    %134 = tpu.matmul %132, %133, %cst_47 {dimension_numbers = #tpu.dot_dimension_numbers<[1], [0], [0], [1], [0, 0, 1, 1], [], []>} : vector<16x64xbf16>, vector<64x32xbf16>, vector<16x32xf32> -> vector<16x32xf32>
    %c41 = arith.constant 41 : index
    %c0_48 = arith.constant 0 : index
    %135 = vector.load %arg1[%c41, %c0_48] : memref<52x128xf32, #tpu.memory_space<vmem>>, vector<1x32xf32>
    %136 = vector.broadcast %135 : vector<1x32xf32> to vector<16x32xf32>
    %137 = arith.addf %134, %136 : vector<16x32xf32>
    %138 = arith.addf %112, %137 : vector<16x32xf32>
    %c42 = arith.constant 42 : index
    %c0_49 = arith.constant 0 : index
    %139 = vector.load %arg1[%c42, %c0_49] : memref<52x128xf32, #tpu.memory_space<vmem>>, vector<1x32xf32>
    %c43 = arith.constant 43 : index
    %c0_50 = arith.constant 0 : index
    %140 = vector.load %arg1[%c43, %c0_50] : memref<52x128xf32, #tpu.memory_space<vmem>>, vector<1x32xf32>
    %cst_51 = arith.constant dense<0.000000e+00> : vector<16xf32>
    %141 = vector.multi_reduction <add>, %138, %cst_51 [1] : vector<16x32xf32> to vector<16xf32>
    %142 = vector.shape_cast %141 : vector<16xf32> to vector<16x1xf32>
    %cst_52 = arith.constant 3.200000e+01 : f32
    %143 = vector.broadcast %cst_52 : f32 to vector<16x1xf32>
    %144 = arith.divf %142, %143 : vector<16x1xf32>
    %145 = vector.broadcast %144 : vector<16x1xf32> to vector<16x32xf32>
    %146 = arith.subf %138, %145 : vector<16x32xf32>
    %147 = arith.mulf %146, %146 : vector<16x32xf32>
    %cst_53 = arith.constant dense<0.000000e+00> : vector<16xf32>
    %148 = vector.multi_reduction <add>, %147, %cst_53 [1] : vector<16x32xf32> to vector<16xf32>
    %149 = vector.shape_cast %148 : vector<16xf32> to vector<16x1xf32>
    %cst_54 = arith.constant 3.200000e+01 : f32
    %150 = vector.broadcast %cst_54 : f32 to vector<16x1xf32>
    %151 = arith.divf %149, %150 : vector<16x1xf32>
    %152 = vector.broadcast %144 : vector<16x1xf32> to vector<16x32xf32>
    %153 = arith.subf %138, %152 : vector<16x32xf32>
    %cst_55 = arith.constant 9.99999996E-13 : f32
    %154 = vector.broadcast %cst_55 : f32 to vector<16x1xf32>
    %155 = arith.addf %151, %154 : vector<16x1xf32>
    %156 = math.rsqrt %155 : vector<16x1xf32>
    %157 = vector.broadcast %156 : vector<16x1xf32> to vector<16x32xf32>
    %158 = arith.mulf %153, %157 : vector<16x32xf32>
    %159 = vector.broadcast %139 : vector<1x32xf32> to vector<16x32xf32>
    %160 = arith.mulf %158, %159 : vector<16x32xf32>
    %161 = vector.broadcast %140 : vector<1x32xf32> to vector<16x32xf32>
    %162 = arith.addf %160, %161 : vector<16x32xf32>
    %c1 = arith.constant 1 : index
    %c0_56 = arith.constant 0 : index
    %c0_57 = arith.constant 0 : index
    %163 = vector.load %arg2[%c1, %c0_56, %c0_57] : memref<3x16x32xf32, #tpu.memory_space<vmem>>, vector<1x16x32xf32>
    %164 = vector.shape_cast %163 : vector<1x16x32xf32> to vector<16x32xf32>
    %165 = vector.shape_cast %162 : vector<16x32xf32> to vector<1x16x32xf32>
    tpu.vector_store %arg2[%c1, %c0_56, %c0_57], %165 {strides = array<i32>} : memref<3x16x32xf32, #tpu.memory_space<vmem>>, vector<1x16x32xf32>,
    %166 = arith.truncf %162 : vector<16x32xf32> to vector<16x32xbf16>
    %c304 = arith.constant 304 : index
    %c0_58 = arith.constant 0 : index
    %167 = vector.load %arg0[%c304, %c0_58] : memref<464x128xbf16, #tpu.memory_space<vmem>>, vector<32x96xbf16>
    %cst_59 = arith.constant dense<0.000000e+00> : vector<16x96xf32>
    %168 = tpu.matmul %166, %167, %cst_59 {dimension_numbers = #tpu.dot_dimension_numbers<[1], [0], [0], [1], [0, 0, 1, 1], [], []>} : vector<16x32xbf16>, vector<32x96xbf16>, vector<16x96xf32> -> vector<16x96xf32>
    %c44 = arith.constant 44 : index
    %c0_60 = arith.constant 0 : index
    %169 = vector.load %arg1[%c44, %c0_60] : memref<52x128xf32, #tpu.memory_space<vmem>>, vector<1x96xf32>
    %170 = vector.broadcast %169 : vector<1x96xf32> to vector<16x96xf32>
    %171 = arith.addf %168, %170 : vector<16x96xf32>
    %172 = vector.extract_strided_slice %171 {offsets = [0, 0], sizes = [16, 16], strides = [1, 1]} : vector<16x96xf32> to vector<16x16xf32>
    %173 = vector.extract_strided_slice %171 {offsets = [0, 32], sizes = [16, 16], strides = [1, 1]} : vector<16x96xf32> to vector<16x16xf32>
    %174 = vector.extract_strided_slice %171 {offsets = [0, 64], sizes = [16, 16], strides = [1, 1]} : vector<16x96xf32> to vector<16x16xf32>
    %175 = arith.truncf %172 : vector<16x16xf32> to vector<16x16xbf16>
    %176 = arith.truncf %173 : vector<16x16xf32> to vector<16x16xbf16>
    %cst_61 = arith.constant dense<0.000000e+00> : vector<16x16xf32>
    %177 = tpu.matmul %175, %176, %cst_61 {dimension_numbers = #tpu.dot_dimension_numbers<[1], [1], [0], [0], [0, 0, 1, 0], [], []>} : vector<16x16xbf16>, vector<16x16xbf16>, vector<16x16xf32> -> vector<16x16xf32>
    %cst_62 = arith.constant 2.500000e-01 : f32
    %178 = vector.broadcast %cst_62 : f32 to vector<16x16xf32>
    %179 = arith.mulf %177, %178 : vector<16x16xf32>
    %180 = arith.addf %179, %32 : vector<16x16xf32>
    %cst_63 = arith.constant dense<0xFF800000> : vector<16xf32>
    %181 = vector.multi_reduction <maximumf>, %180, %cst_63 [1] : vector<16x16xf32> to vector<16xf32>
    %182 = vector.shape_cast %181 : vector<16xf32> to vector<16x1xf32>
    %183 = vector.broadcast %182 : vector<16x1xf32> to vector<16x16xf32>
    %184 = arith.subf %180, %183 : vector<16x16xf32>
    %185 = math.exp %184 : vector<16x16xf32>
    %cst_64 = arith.constant dense<0.000000e+00> : vector<16xf32>
    %186 = vector.multi_reduction <add>, %185, %cst_64 [1] : vector<16x16xf32> to vector<16xf32>
    %187 = vector.shape_cast %186 : vector<16xf32> to vector<16x1xf32>
    %188 = vector.broadcast %187 : vector<16x1xf32> to vector<16x16xf32>
    %189 = arith.divf %185, %188 : vector<16x16xf32>
    %190 = arith.truncf %189 : vector<16x16xf32> to vector<16x16xbf16>
    %191 = arith.truncf %174 : vector<16x16xf32> to vector<16x16xbf16>
    %cst_65 = arith.constant dense<0.000000e+00> : vector<16x16xf32>
    %192 = tpu.matmul %190, %191, %cst_65 {dimension_numbers = #tpu.dot_dimension_numbers<[1], [0], [0], [1], [0, 0, 1, 1], [], []>} : vector<16x16xbf16>, vector<16x16xbf16>, vector<16x16xf32> -> vector<16x16xf32>
    %193 = vector.extract_strided_slice %171 {offsets = [0, 16], sizes = [16, 16], strides = [1, 1]} : vector<16x96xf32> to vector<16x16xf32>
    %194 = vector.extract_strided_slice %171 {offsets = [0, 48], sizes = [16, 16], strides = [1, 1]} : vector<16x96xf32> to vector<16x16xf32>
    %195 = vector.extract_strided_slice %171 {offsets = [0, 80], sizes = [16, 16], strides = [1, 1]} : vector<16x96xf32> to vector<16x16xf32>
    %196 = arith.truncf %193 : vector<16x16xf32> to vector<16x16xbf16>
    %197 = arith.truncf %194 : vector<16x16xf32> to vector<16x16xbf16>
    %cst_66 = arith.constant dense<0.000000e+00> : vector<16x16xf32>
    %198 = tpu.matmul %196, %197, %cst_66 {dimension_numbers = #tpu.dot_dimension_numbers<[1], [1], [0], [0], [0, 0, 1, 0], [], []>} : vector<16x16xbf16>, vector<16x16xbf16>, vector<16x16xf32> -> vector<16x16xf32>
    %cst_67 = arith.constant 2.500000e-01 : f32
    %199 = vector.broadcast %cst_67 : f32 to vector<16x16xf32>
    %200 = arith.mulf %198, %199 : vector<16x16xf32>
    %201 = arith.addf %200, %32 : vector<16x16xf32>
    %cst_68 = arith.constant dense<0xFF800000> : vector<16xf32>
    %202 = vector.multi_reduction <maximumf>, %201, %cst_68 [1] : vector<16x16xf32> to vector<16xf32>
    %203 = vector.shape_cast %202 : vector<16xf32> to vector<16x1xf32>
    %204 = vector.broadcast %203 : vector<16x1xf32> to vector<16x16xf32>
    %205 = arith.subf %201, %204 : vector<16x16xf32>
    %206 = math.exp %205 : vector<16x16xf32>
    %cst_69 = arith.constant dense<0.000000e+00> : vector<16xf32>
    %207 = vector.multi_reduction <add>, %206, %cst_69 [1] : vector<16x16xf32> to vector<16xf32>
    %208 = vector.shape_cast %207 : vector<16xf32> to vector<16x1xf32>
    %209 = vector.broadcast %208 : vector<16x1xf32> to vector<16x16xf32>
    %210 = arith.divf %206, %209 : vector<16x16xf32>
    %211 = arith.truncf %210 : vector<16x16xf32> to vector<16x16xbf16>
    %212 = arith.truncf %195 : vector<16x16xf32> to vector<16x16xbf16>
    %cst_70 = arith.constant dense<0.000000e+00> : vector<16x16xf32>
    %213 = tpu.matmul %211, %212, %cst_70 {dimension_numbers = #tpu.dot_dimension_numbers<[1], [0], [0], [1], [0, 0, 1, 1], [], []>} : vector<16x16xbf16>, vector<16x16xbf16>, vector<16x16xf32> -> vector<16x16xf32>
    %214 = tpu.concatenate %192, %213 in 1 : vector<16x16xf32>, vector<16x16xf32> -> vector<16x32xf32>
    %215 = arith.truncf %214 : vector<16x32xf32> to vector<16x32xbf16>
    %c336 = arith.constant 336 : index
    %c0_71 = arith.constant 0 : index
    %216 = vector.load %arg0[%c336, %c0_71] : memref<464x128xbf16, #tpu.memory_space<vmem>>, vector<32x32xbf16>
    %cst_72 = arith.constant dense<0.000000e+00> : vector<16x32xf32>
    %217 = tpu.matmul %215, %216, %cst_72 {dimension_numbers = #tpu.dot_dimension_numbers<[1], [0], [0], [1], [0, 0, 1, 1], [], []>} : vector<16x32xbf16>, vector<32x32xbf16>, vector<16x32xf32> -> vector<16x32xf32>
    %c45 = arith.constant 45 : index
    %c0_73 = arith.constant 0 : index
    %218 = vector.load %arg1[%c45, %c0_73] : memref<52x128xf32, #tpu.memory_space<vmem>>, vector<1x32xf32>
    %219 = vector.broadcast %218 : vector<1x32xf32> to vector<16x32xf32>
    %220 = arith.addf %217, %219 : vector<16x32xf32>
    %221 = arith.addf %162, %220 : vector<16x32xf32>
    %c46 = arith.constant 46 : index
    %c0_74 = arith.constant 0 : index
    %222 = vector.load %arg1[%c46, %c0_74] : memref<52x128xf32, #tpu.memory_space<vmem>>, vector<1x32xf32>
    %c47 = arith.constant 47 : index
    %c0_75 = arith.constant 0 : index
    %223 = vector.load %arg1[%c47, %c0_75] : memref<52x128xf32, #tpu.memory_space<vmem>>, vector<1x32xf32>
    %cst_76 = arith.constant dense<0.000000e+00> : vector<16xf32>
    %224 = vector.multi_reduction <add>, %221, %cst_76 [1] : vector<16x32xf32> to vector<16xf32>
    %225 = vector.shape_cast %224 : vector<16xf32> to vector<16x1xf32>
    %cst_77 = arith.constant 3.200000e+01 : f32
    %226 = vector.broadcast %cst_77 : f32 to vector<16x1xf32>
    %227 = arith.divf %225, %226 : vector<16x1xf32>
    %228 = vector.broadcast %227 : vector<16x1xf32> to vector<16x32xf32>
    %229 = arith.subf %221, %228 : vector<16x32xf32>
    %230 = arith.mulf %229, %229 : vector<16x32xf32>
    %cst_78 = arith.constant dense<0.000000e+00> : vector<16xf32>
    %231 = vector.multi_reduction <add>, %230, %cst_78 [1] : vector<16x32xf32> to vector<16xf32>
    %232 = vector.shape_cast %231 : vector<16xf32> to vector<16x1xf32>
    %cst_79 = arith.constant 3.200000e+01 : f32
    %233 = vector.broadcast %cst_79 : f32 to vector<16x1xf32>
    %234 = arith.divf %232, %233 : vector<16x1xf32>
    %235 = vector.broadcast %227 : vector<16x1xf32> to vector<16x32xf32>
    %236 = arith.subf %221, %235 : vector<16x32xf32>
    %cst_80 = arith.constant 9.99999996E-13 : f32
    %237 = vector.broadcast %cst_80 : f32 to vector<16x1xf32>
    %238 = arith.addf %234, %237 : vector<16x1xf32>
    %239 = math.rsqrt %238 : vector<16x1xf32>
    %240 = vector.broadcast %239 : vector<16x1xf32> to vector<16x32xf32>
    %241 = arith.mulf %236, %240 : vector<16x32xf32>
    %242 = vector.broadcast %222 : vector<1x32xf32> to vector<16x32xf32>
    %243 = arith.mulf %241, %242 : vector<16x32xf32>
    %244 = vector.broadcast %223 : vector<1x32xf32> to vector<16x32xf32>
    %245 = arith.addf %243, %244 : vector<16x32xf32>
    %246 = arith.truncf %245 : vector<16x32xf32> to vector<16x32xbf16>
    %c368 = arith.constant 368 : index
    %c0_81 = arith.constant 0 : index
    %247 = vector.load %arg0[%c368, %c0_81] : memref<464x128xbf16, #tpu.memory_space<vmem>>, vector<32x64xbf16>
    %cst_82 = arith.constant dense<0.000000e+00> : vector<16x64xf32>
    %248 = tpu.matmul %246, %247, %cst_82 {dimension_numbers = #tpu.dot_dimension_numbers<[1], [0], [0], [1], [0, 0, 1, 1], [], []>} : vector<16x32xbf16>, vector<32x64xbf16>, vector<16x64xf32> -> vector<16x64xf32>
    %c48 = arith.constant 48 : index
    %c0_83 = arith.constant 0 : index
    %249 = vector.load %arg1[%c48, %c0_83] : memref<52x128xf32, #tpu.memory_space<vmem>>, vector<1x64xf32>
    %250 = vector.broadcast %249 : vector<1x64xf32> to vector<16x64xf32>
    %251 = arith.addf %248, %250 : vector<16x64xf32>
    %252 = arith.mulf %251, %251 : vector<16x64xf32>
    %253 = arith.mulf %251, %252 : vector<16x64xf32>
    %cst_84 = arith.constant 4.471500e-02 : f32
    %254 = vector.broadcast %cst_84 : f32 to vector<16x64xf32>
    %255 = arith.mulf %254, %253 : vector<16x64xf32>
    %256 = arith.addf %251, %255 : vector<16x64xf32>
    %cst_85 = arith.constant 0.797884583 : f32
    %257 = vector.broadcast %cst_85 : f32 to vector<16x64xf32>
    %258 = arith.mulf %257, %256 : vector<16x64xf32>
    %259 = math.tanh %258 : vector<16x64xf32>
    %cst_86 = arith.constant 1.000000e+00 : f32
    %260 = vector.broadcast %cst_86 : f32 to vector<16x64xf32>
    %261 = arith.addf %260, %259 : vector<16x64xf32>
    %cst_87 = arith.constant 5.000000e-01 : f32
    %262 = vector.broadcast %cst_87 : f32 to vector<16x64xf32>
    %263 = arith.mulf %262, %261 : vector<16x64xf32>
    %264 = arith.mulf %251, %263 : vector<16x64xf32>
    %265 = arith.truncf %264 : vector<16x64xf32> to vector<16x64xbf16>
    %c400 = arith.constant 400 : index
    %c0_88 = arith.constant 0 : index
    %266 = vector.load %arg0[%c400, %c0_88] : memref<464x128xbf16, #tpu.memory_space<vmem>>, vector<64x32xbf16>
    %cst_89 = arith.constant dense<0.000000e+00> : vector<16x32xf32>
    %267 = tpu.matmul %265, %266, %cst_89 {dimension_numbers = #tpu.dot_dimension_numbers<[1], [0], [0], [1], [0, 0, 1, 1], [], []>} : vector<16x64xbf16>, vector<64x32xbf16>, vector<16x32xf32> -> vector<16x32xf32>
    %c49 = arith.constant 49 : index
    %c0_90 = arith.constant 0 : index
    %268 = vector.load %arg1[%c49, %c0_90] : memref<52x128xf32, #tpu.memory_space<vmem>>, vector<1x32xf32>
    %269 = vector.broadcast %268 : vector<1x32xf32> to vector<16x32xf32>
    %270 = arith.addf %267, %269 : vector<16x32xf32>
    %271 = arith.addf %245, %270 : vector<16x32xf32>
    %c50 = arith.constant 50 : index
    %c0_91 = arith.constant 0 : index
    %272 = vector.load %arg1[%c50, %c0_91] : memref<52x128xf32, #tpu.memory_space<vmem>>, vector<1x32xf32>
    %c51 = arith.constant 51 : index
    %c0_92 = arith.constant 0 : index
    %273 = vector.load %arg1[%c51, %c0_92] : memref<52x128xf32, #tpu.memory_space<vmem>>, vector<1x32xf32>
    %cst_93 = arith.constant dense<0.000000e+00> : vector<16xf32>
    %274 = vector.multi_reduction <add>, %271, %cst_93 [1] : vector<16x32xf32> to vector<16xf32>
    %275 = vector.shape_cast %274 : vector<16xf32> to vector<16x1xf32>
    %cst_94 = arith.constant 3.200000e+01 : f32
    %276 = vector.broadcast %cst_94 : f32 to vector<16x1xf32>
    %277 = arith.divf %275, %276 : vector<16x1xf32>
    %278 = vector.broadcast %277 : vector<16x1xf32> to vector<16x32xf32>
    %279 = arith.subf %271, %278 : vector<16x32xf32>
    %280 = arith.mulf %279, %279 : vector<16x32xf32>
    %cst_95 = arith.constant dense<0.000000e+00> : vector<16xf32>
    %281 = vector.multi_reduction <add>, %280, %cst_95 [1] : vector<16x32xf32> to vector<16xf32>
    %282 = vector.shape_cast %281 : vector<16xf32> to vector<16x1xf32>
    %cst_96 = arith.constant 3.200000e+01 : f32
    %283 = vector.broadcast %cst_96 : f32 to vector<16x1xf32>
    %284 = arith.divf %282, %283 : vector<16x1xf32>
    %285 = vector.broadcast %277 : vector<16x1xf32> to vector<16x32xf32>
    %286 = arith.subf %271, %285 : vector<16x32xf32>
    %cst_97 = arith.constant 9.99999996E-13 : f32
    %287 = vector.broadcast %cst_97 : f32 to vector<16x1xf32>
    %288 = arith.addf %284, %287 : vector<16x1xf32>
    %289 = math.rsqrt %288 : vector<16x1xf32>
    %290 = vector.broadcast %289 : vector<16x1xf32> to vector<16x32xf32>
    %291 = arith.mulf %286, %290 : vector<16x32xf32>
    %292 = vector.broadcast %272 : vector<1x32xf32> to vector<16x32xf32>
    %293 = arith.mulf %291, %292 : vector<16x32xf32>
    %294 = vector.broadcast %273 : vector<1x32xf32> to vector<16x32xf32>
    %295 = arith.addf %293, %294 : vector<16x32xf32>
    %c2 = arith.constant 2 : index
    %c0_98 = arith.constant 0 : index
    %c0_99 = arith.constant 0 : index
    %296 = vector.load %arg2[%c2, %c0_98, %c0_99] : memref<3x16x32xf32, #tpu.memory_space<vmem>>, vector<1x16x32xf32>
    %297 = vector.shape_cast %296 : vector<1x16x32xf32> to vector<16x32xf32>
    %298 = vector.shape_cast %295 : vector<16x32xf32> to vector<1x16x32xf32>
    tpu.vector_store %arg2[%c2, %c0_98, %c0_99], %298 {strides = array<i32>} : memref<3x16x32xf32, #tpu.memory_space<vmem>>, vector<1x16x32xf32>,
    %c32 = arith.constant 32 : index
    %c0_100 = arith.constant 0 : index
    %299 = vector.load %arg1[%c32, %c0_100] : memref<52x128xf32, #tpu.memory_space<vmem>>, vector<2x16xf32>
    %cst_101 = arith.constant dense<0.000000e+00> : vector<2x32xf32>
    %300 = tpu.matmul %299, %295, %cst_101 {dimension_numbers = #tpu.dot_dimension_numbers<[1], [0], [0], [1], [0, 0, 1, 1], [], []>} : vector<2x16xf32>, vector<16x32xf32>, vector<2x32xf32> -> vector<2x32xf32>
    %c0_102 = arith.constant 0 : index
    %c0_103 = arith.constant 0 : index
    %301 = vector.load %arg3[%c0_102, %c0_103] : memref<2x32xf32, #tpu.memory_space<vmem>>, vector<2x32xf32>
    tpu.vector_store %arg3[%c0_102, %c0_103], %300 {strides = array<i32>} : memref<2x32xf32, #tpu.memory_space<vmem>>, vector<2x32xf32>,
    return
  }
}

</mosaic_0001>

<bundles_post_ra>
// kernel: eq.1
= control target key start
LH: loop header
LB: loop body
LE: loop exit
PB: predicated region body
PF: predicated region fallthrough
CT: control target
= control target key end

     0   :  { %vm7_vm0 = vcmask 64512   ;;  %vm13_vm1 = vcmask 130112   ;;  %s39_s0 = inlined_call_operand.vmem [shape: s32[2,8], index: 0, kind: input, shape index: {}]   ;;  %s40_s1 = inlined_call_operand.vmem [shape: s32[16], index: 1, kind: output, shape index: {}]  }
   0x1   :  { %v4_v0 = vld [vmem:[%s39_s0] sm:$0x3]  ;;  %s22_s0 = smov 8  }
   0x2   :  { %5 = vst [vmem:[#allocation1] sm:$0x3] %v4_v0 }
   0x9   :  { %v10_v1 = vld [vmem:[#allocation1 + $0x1] sm:$0x1]   ;;  %v6_v2 = vld [vmem:[#allocation1] sm:$0x1]  }
   0xa   :  { %11 = vrot.lane.b32.xlu0 %v10_v1, %s22_s0  ;;  %8 = vst.msk [vmem:[#allocation0] sm:$0x1] %vm7_vm0, %v6_v2  }
  0x7c   :  { %v12_v3 = vpop.permute.xlu0 %11  }
  0x7d   :  { %14 = vst.msk [vmem:[#allocation0] sm:$0x1] %vm13_vm1, %v12_v3  }
  0x84   :  { %v18_v4 = vld [vmem:[#allocation0] sm:$0x1] }
  0x85   :  { %20 = vst [vmem:[%s40_s1] sm:$0x1] %v18_v4 }

// kernel: transformer_forward.1
= control target key start
LH: loop header
LB: loop body
LE: loop exit
PB: predicated region body
PF: predicated region fallthrough
CT: control target
= control target key end

     0   :  { %v1969_v1 = vmov 0.0   ;;  %vm1970_vm0 = vmmov 0   ;;  %s2387_s0 = inlined_call_operand.vmem [shape: bf16[464,128], index: 0, kind: input, shape index: {}]   ;;  %s2388_s1 = inlined_call_operand.vmem [shape: f32[52,128], index: 1, kind: input, shape index: {}]   ;;  %s2389_s2 = inlined_call_operand.vmem [shape: f32[3,16,32], index: 2, kind: output, shape index: {0}]   ;;  %s2390_s3 = inlined_call_operand.hbm [shape: f32[2,32], index: 3, kind: output, shape index: {1}]  }
   0x1   :  { %v1856_v0 = vld [vmem:[%s2387_s0 + $0x8] sm:$0xff]   ;;  %1686 = vmatprep.subr.bf16.mxu0 %v1969_v1  ;;  %1706 = vmatprep.subr.bf16.mxu1 %v1969_v1  ;;  %v1857_v2 = vld [vmem:[%s2387_s0 + $0x10] sm:$0xff]   ;;  %v1858_v3 = vld [vmem:[%s2387_s0 + $0x18] sm:$0xff]  }
   0x2   :  { %1687 = vmatpush3.bf16.msra.mxu0 %v1856_v0  ;;  %1702 = vmatprep.mubr.msk.bf16.mxu0 %vm1970_vm0, %v1969_v1  ;;  %v1859_v4 = vld [vmem:[%s2387_s0 + $0x20] sm:$0xff]   ;;  %v1860_v5 = vld [vmem:[%s2387_s0 + $0x28] sm:$0xff]   ;;  %v1861_v6 = vld [vmem:[%s2387_s0 + $0x30] sm:$0xff]  }
   0x3   :  { %1688 = vmatprep.subr.bf16.mxu0 %v1969_v1  ;;  %1710 = vmatprep.mubr.msk.bf16.mxu1 %vm1970_vm0, %v1969_v1  ;;  %v1862_v7 = vld [vmem:[%s2387_s0 + $0x38] sm:$0xff]  }
   0x6   :  { %1689 = vmatpush3.bf16.msra.mxu0 %v1857_v2 }
   0x7   :  { %1690 = vmatprep.subr.bf16.mxu0 %v1969_v1 }
   0xa   :  { %1691 = vmatpush3.bf16.msra.mxu0 %v1858_v3 }
   0xb   :  { %1692 = vmatprep.subr.bf16.mxu0 %v1969_v1 }
   0xe   :  { %1693 = vmatpush3.bf16.msra.mxu0 %v1859_v4 }
   0xf   :  { %1694 = vmatprep.subr.bf16.mxu0 %v1969_v1 }
  0x12   :  { %1695 = vmatpush3.bf16.msra.mxu0 %v1860_v5 }
  0x13   :  { %1696 = vmatprep.subr.bf16.mxu0 %v1969_v1 }
  0x16   :  { %1697 = vmatpush3.bf16.msra.mxu0 %v1861_v6 }
  0x17   :  { %9 = vsyncpa [#allocation3], 0  ;;  %1698 = vmatprep.subr.bf16.mxu0 %v1969_v1  ;;  %v1863_v8 = vld [vmem:[%s2387_s0 + $0x40] sm:$0xff]   ;;  %v34_v12 = vld [vmem:[%s2388_s1 + $0x8] sm:$0xff]  ;;  %vm132_vm1 = vcmask 261120   ;;  %s1971_s21 = smov 96  }
  0x18   :  { %v1864_v9 = vld [vmem:[%s2387_s0] sm:$0xff]   ;;  %v1865_v30 = vld [vmem:[%s2387_s0 + $0x48] sm:$0xff]   ;;  %v1866_v31 = vld [vmem:[%s2387_s0 + $0x50] sm:$0xff]   ;;  %s1972_s22 = smov 80   ;;  %s1973_s23 = smov 112   ;;  %vm246_vm2 = vcmask 130048  }
  0x19   :  { %v33_v10 = vld [vmem:[%s2388_s1] sm:$0xff]  ;;  %1707 = vmatpush3.bf16.msra.mxu1 %v1865_v30  ;;  %v2105_v60 = vld [vmem:[%s2388_s1 + $0x10] sm:$0xff]  ;;  %v2110_v0 = vld [vmem:[%s2388_s1 + $0x18] sm:$0xff]  ;;  %s1974_s28 = smov 64   ;;  %s1975_s29 = smov 48   ;;  %vm733_vm3 = vcmask 523264  }
  0x1a   :  { %1699 = vmatpush3.bf16.msra.mxu0 %v1862_v7  ;;  %1708 = vmatprep.subr.bf16.mxu1 %v1969_v1  ;;  %v1571_v39 = vld [vmem:[%s2388_s1 + $0x22] ss:$0 sm:$0xff]  ;;  %v1572_v41 = vld [vmem:[%s2388_s1 + $0x23] ss:$0 sm:$0xff]  ;;  %v1573_v49 = vld [vmem:[%s2388_s1 + $0x24] ss:$0 sm:$0xff] }
  0x1b   :  { %1700 = vmatprep.subr.bf16.mxu0 %v1969_v1  ;;  %s1976_s7 = smov 16   ;;  %s1978_s30 = smov [#allocation2]   ;;  %vm1542_vm4 = vcmask 254976  }
  0x1c   :  { %s1552_s4 = sshll.u32 %s1978_s30, 4  ;;  %s1553_s4 = int_to_ptr.vmem [resolvable:$true] %s1552_s4 }
  0x1d   :  { %1709 = vmatpush3.bf16.msra.mxu1 %v1866_v31  ;;  %s1945_s5 = scalar_lea.vmem %s1553_s4, 32  ;;  %p1950_p1 = scmp.lt.s32.totalorder %s1553_s4, %s1553_s4 }
  0x1e   :  { %1701 = vmatpush3.bf16.msra.mxu0 %v1863_v8  ;;  %1714 = vmatprep.subr.bf16.mxu1 %v1969_v1  ;;  %p1946_p0 = scmp.ne.s32.totalorder %s1553_s4, %s1945_s5  ;;  %p1951_p2 = scmp.lt.s32.totalorder %s1945_s5, %s1945_s5 }
  0x1f   :  { %1746 = vmatprep.subr.bf16.mxu0 %v1969_v1 }
  0x20   :  { %p1952_p3 = por %p1951_p2, %p1950_p1 }
  0x21   :  { %1703 = vmatmul.mubr.bf16.vlgmr.msra.gmra.mrb[0].mxu0 %v1864_v9 }
  0x22   :  { %1750 = vmatprep.mubr.msk.bf16.mxu0 %vm1970_vm0, %v1969_v1  ;;  %p1953_p4 = pnand %p1952_p3, %p1946_p0 }
  0xf4   :  { %v123_v11 = vpop.f32.mrb[0].mxu0 }
  0xf5   :  { %v124_v13 = vadd.f32 %v123_v11, %v33_v10  ;;  %v1704_v14 = vpop.f32.mrb[1].mxu0 }
  0xf6   :  { %v126_v15 = vpop.f32.mrb[2].mxu0 }
  0xf7   :  { %v127_v16 = vadd.f32 %v126_v15, %v34_v12  ;;  %v1705_v17 = vpop.f32.mrb[3].mxu0  ;;  %v133_v18 = vsel %vm132_vm1, %v124_v13, 0.0 }
  0xf8   :  { %134 = vadd.xlane.f32.xlu0 %v133_v18 }
  0xf9   :  { %v136_v19 = vsel %vm132_vm1, %v127_v16, 0.0 }
  0xfc   :  { %137 = vadd.xlane.f32.xlu0 %v136_v19 }
 0x185   :  { %v135_v20 = vpop.xlane.xlu0 %134 }
 0x186   :  { %v140_v21 = vmul.f32 0.03125, %v135_v20 }
 0x188   :  { %v142_v22 = vsub.f32 %v124_v13, %v140_v21 }
 0x189   :  { %v138_v23 = vpop.xlane.xlu0 %137 }
 0x18a   :  { %v141_v24 = vmul.f32 0.03125, %v138_v23  ;;  %v144_v25 = vmul.f32 %v142_v22, %v142_v22 }
 0x18c   :  { %v143_v26 = vsub.f32 %v127_v16, %v141_v24  ;;  %v146_v27 = vsel %vm132_vm1, %v144_v25, 0.0 }
 0x18d   :  { %147 = vadd.xlane.f32.xlu1 %v146_v27 }
 0x18e   :  { %v145_v28 = vmul.f32 %v143_v26, %v143_v26 }
 0x190   :  { %v149_v29 = vsel %vm132_vm1, %v145_v28, 0.0 }
 0x191   :  { %150 = vadd.xlane.f32.xlu1 %v149_v29 }
 0x21a   :  { %v148_v32 = vpop.xlane.xlu1 %147 }
 0x21b   :  { %v152_v33 = vmul.f32 0.03125, %v148_v32 }
 0x21d   :  { %v154_v34 = vadd.f32 1e-12, %v152_v33 }
 0x21e   :  { %v151_v35 = vpop.xlane.xlu1 %150 }
 0x21f   :  { %1885 = vrsqrt.f32 %v154_v34  ;;  %v153_v36 = vmul.f32 0.03125, %v151_v35 }
 0x221   :  { %v155_v37 = vadd.f32 1e-12, %v153_v36 }
 0x223   :  { %1887 = vrsqrt.f32 %v155_v37 }
 0x229   :  { %v1886_v38 = vpop.eup %1885 }
 0x22a   :  { %v158_v40 = vmul.f32 %v1886_v38, %v142_v22 }
 0x22c   :  { %v164_v42 = vmul.f32 %v1571_v39, %v158_v40 }
 0x22d   :  { %v1888_v43 = vpop.eup %1887 }
 0x22e   :  { %v159_v44 = vmul.f32 %v1888_v43, %v143_v26  ;;  %v2066_v45 = vadd.f32 %v1572_v41, %v164_v42 }
 0x230   :  { %v165_v46 = vmul.f32 %v1571_v39, %v159_v44  ;;  %172 = vst.msk [vmem:[%s2389_s2] sm:$0xff] %vm132_vm1, %v2066_v45 }
 0x232   :  { %v2073_v47 = vadd.f32 %v1572_v41, %v165_v46 }
 0x234   :  { %173 = vst.msk [vmem:[%s2389_s2 + $0x8] sm:$0xff] %vm132_vm1, %v2073_v47  ;;  %v176_v48 = vpack.c.bf16 %v2073_v47, %v2066_v45 }
 0x236   :  { %1711 = vmatmul.mubr.msk.bf16.vlgmr.msra.gmra.mrb[0].mxu1 %vm132_vm1, %v176_v48 }
 0x237   :  { %1716 = vmatprep.mubr.msk.bf16.mxu1 %vm1970_vm0, %v1969_v1 }
 0x309   :  { %v235_v50 = vpop.f32.mrb[0].mxu1 }
 0x30a   :  { %v1712_v51 = vpop.f32.mrb[1].mxu1  ;;  %v236_v53 = vadd.f32 %v1573_v49, %v235_v50 }
 0x30b   :  { %v238_v52 = vpop.f32.mrb[2].mxu1 }
 0x30c   :  { %v239_v54 = vadd.f32 %v1573_v49, %v238_v52  ;;  %v1713_v55 = vpop.f32.mrb[3].mxu1 }
 0x30e   :  { %v2088_v56 = vpack.c.bf16 %v239_v54, %v236_v53 }
 0x310   :  { %244 = vrot.lane.b32.xlu0 %v2088_v56, %s1971_s21 }
 0x314   :  { %370 = vrot.lane.b32.xlu0 %v2088_v56, %s1972_s22 }
 0x318   :  { %368 = vrot.lane.b32.xlu0 %v2088_v56, %s1973_s23 }
 0x382   :  { %v245_v57 = vpop.permute.xlu0 %244 }
 0x383   :  { %v251_v58 = vsel %vm246_vm2, %v245_v57, 0 }
 0x384   :  { %1715 = vmatpush3.bf16.xpose.msra.mxu1 %v251_v58 }
 0x385   :  { %1720 = vmatprep.subr.bf16.mxu1 %v1969_v1 }
 0x386   :  { %v371_v25 = vpop.permute.xlu0 %370 }
 0x387   :  { %v376_v27 = vsel %vm246_vm2, %v371_v25, 0 }
 0x38a   :  { %v369_v28 = vpop.permute.xlu0 %368 }
 0x38b   :  { %1717 = vmatmul.mubr.msk.bf16.vlgmr.msra.gmra.mrb[4].mxu1 %vm246_vm2, %v2088_v56 }
 0x38c   :  { %1722 = vmatprep.mubr.msk.bf16.mxu1 %vm1970_vm0, %v1969_v1 }
 0x45e   :  { %v287_v59 = vpop.f32.mrb[4].mxu1 }
 0x45f   :  { %v294_v61 = vmul.f32 0.25, %v287_v59  ;;  %v1718_v62 = vpop.f32.mrb[5].mxu1 }
 0x460   :  { %v290_v63 = vpop.f32.mrb[6].mxu1 }
 0x461   :  { %v295_v2 = vmul.f32 0.25, %v290_v63  ;;  %v1719_v3 = vpop.f32.mrb[7].mxu1  ;;  %v296_v4 = vadd.f32 %v294_v61, %v2105_v60 }
 0x462   :  { %v1868_v3 = vld [vmem:[%s2387_s0 + $0x60] sm:$0xff]  }
 0x463   :  { %v298_v5 = vsel %vm246_vm2, %v296_v4, -inf  ;;  %v297_v6 = vadd.f32 %v295_v2, %v2110_v0 }
 0x464   :  { %299 = vmax.xlane.f32.xlu1 %v298_v5 }
 0x465   :  { %v301_v7 = vsel %vm246_vm2, %v297_v6, -inf }
 0x468   :  { %302 = vmax.xlane.f32.xlu1 %v301_v7 }
 0x4f1   :  { %v300_v8 = vpop.xlane.xlu1 %299 }
 0x4f2   :  { %v304_v9 = vsub.f32 %v296_v4, %v300_v8 }
 0x4f4   :  { %v306_v10 = vmul.f32 1.442695, %v304_v9 }
 0x4f5   :  { %v303_v11 = vpop.xlane.xlu1 %302 }
 0x4f6   :  { %1889 = vpow2.f32 %v306_v10  ;;  %v305_v12 = vsub.f32 %v297_v6, %v303_v11 }
 0x4f8   :  { %v308_v13 = vmul.f32 1.442695, %v305_v12 }
 0x4fa   :  { %1891 = vpow2.f32 %v308_v13 }
 0x500   :  { %v1890_v14 = vpop.eup %1889 }
 0x501   :  { %v310_v15 = vsel %vm246_vm2, %v1890_v14, 0.0 }
 0x502   :  { %311 = vadd.xlane.f32.xlu1 %v310_v15  ;;  %v1581_v15 = vld [vmem:[%s2388_s1 + $0x25] ss:$0 sm:$0xff] }
 0x504   :  { %v1892_v16 = vpop.eup %1891 }
 0x505   :  { %v313_v17 = vsel %vm246_vm2, %v1892_v16, 0.0 }
 0x506   :  { %314 = vadd.xlane.f32.xlu1 %v313_v17 }
 0x517   :  { %321 = vrot.lane.b32.xlu1 %v2088_v56, %s1974_s28 }
 0x58f   :  { %v312_v18 = vpop.xlane.xlu1 %311 }
 0x590   :  { %1893 = vrcp.f32 %v312_v18 }
 0x593   :  { %v315_v19 = vpop.xlane.xlu1 %314 }
 0x594   :  { %1895 = vrcp.f32 %v315_v19 }
 0x597   :  { %v322_v20 = vpop.permute.xlu1 %321 }
 0x598   :  { %1721 = vmatpush3.bf16.msra.mxu1 %v322_v20 }
 0x599   :  { %1726 = vmatprep.subr.bf16.mxu1 %v1969_v1 }
 0x59a   :  { %v1894_v21 = vpop.eup %1893 }
 0x59b   :  { %v317_v23 = vmul.f32 %v1894_v21, %v1890_v14 }
 0x59e   :  { %v1896_v22 = vpop.eup %1895 }
 0x59f   :  { %v319_v24 = vmul.f32 %v1896_v22, %v1892_v16 }
 0x5a1   :  { %v320_v26 = vpack.c.bf16 %v319_v24, %v317_v23 }
 0x5a3   :  { %1723 = vmatmul.mubr.msk.bf16.vlgmr.msra.gmra.mrb[8].mxu1 %vm246_vm2, %v320_v26 }
 0x5a4   :  { %1727 = vmatpush3.bf16.xpose.msra.mxu1 %v376_v27  ;;  %1728 = vmatprep.mubr.msk.bf16.mxu1 %vm1970_vm0, %v1969_v1 }
 0x5a5   :  { %1732 = vmatprep.subr.bf16.mxu1 %v1969_v1 }
 0x5ab   :  { %1729 = vmatmul.mubr.msk.bf16.vlgmr.msra.gmra.mrb[12].mxu1 %vm246_vm2, %v369_v28 }
 0x5ac   :  { %1734 = vmatprep.mubr.msk.bf16.mxu1 %vm1970_vm0, %v1969_v1 }
 0x676   :  { %v2129_v29 = vpop.f32.mrb[8].mxu1 }
 0x677   :  { %v1724_v30 = vpop.f32.mrb[9].mxu1 }
 0x678   :  { %v364_v31 = vpop.f32.mrb[10].mxu1 }
 0x679   :  { %v1725_v32 = vpop.f32.mrb[11].mxu1 }
 0x67e   :  { %v412_v33 = vpop.f32.mrb[12].mxu1 }
 0x67f   :  { %v419_v34 = vmul.f32 0.25, %v412_v33  ;;  %v1730_v35 = vpop.f32.mrb[13].mxu1 }
 0x680   :  { %v415_v36 = vpop.f32.mrb[14].mxu1  ;;  %v1870_v35 = vld [vmem:[%s2387_s0 + $0x70] sm:$0xff]  }
 0x681   :  { %v420_v37 = vmul.f32 0.25, %v415_v36  ;;  %v1731_v38 = vpop.f32.mrb[15].mxu1  ;;  %v421_v39 = vadd.f32 %v419_v34, %v2105_v60 }
 0x683   :  { %v423_v40 = vsel %vm246_vm2, %v421_v39, -inf  ;;  %v422_v41 = vadd.f32 %v420_v37, %v2110_v0 }
 0x684   :  { %424 = vmax.xlane.f32.xlu0 %v423_v40 }
 0x685   :  { %v426_v42 = vsel %vm246_vm2, %v422_v41, -inf }
 0x686   :  { %427 = vmax.xlane.f32.xlu1 %v426_v42 }
 0x711   :  { %v425_v43 = vpop.xlane.xlu0 %424 }
 0x712   :  { %v429_v44 = vsub.f32 %v421_v39, %v425_v43  ;;  %v1585_v43 = vld [vmem:[%s2388_s1 + $0x26] ss:$0 sm:$0xff] }
 0x713   :  { %v428_v46 = vpop.xlane.xlu1 %427 }
 0x714   :  { %v431_v48 = vmul.f32 1.442695, %v429_v44  ;;  %v430_v49 = vsub.f32 %v422_v41, %v428_v46 }
 0x716   :  { %1897 = vpow2.f32 %v431_v48  ;;  %v433_v50 = vmul.f32 1.442695, %v430_v49 }
 0x718   :  { %1899 = vpow2.f32 %v433_v50  ;;  %v1586_v50 = vld [vmem:[%s2388_s1 + $0x27] ss:$0 sm:$0xff] }
 0x720   :  { %v1898_v51 = vpop.eup %1897 }
 0x721   :  { %v435_v52 = vsel %vm246_vm2, %v1898_v51, 0.0 }
 0x722   :  { %v1900_v53 = vpop.eup %1899  ;;  %436 = vadd.xlane.f32.xlu0 %v435_v52 }
 0x723   :  { %v438_v54 = vsel %vm246_vm2, %v1900_v53, 0.0 }
 0x726   :  { %439 = vadd.xlane.f32.xlu0 %v438_v54 }
 0x73c   :  { %446 = vrot.lane.b32.xlu0 %v2088_v56, %s1975_s29  ;;  %v1867_v56 = vld [vmem:[%s2387_s0 + $0x58] sm:$0xff]  }
 0x7af   :  { %v437_v55 = vpop.xlane.xlu0 %436 }
 0x7b0   :  { %1901 = vrcp.f32 %v437_v55  ;;  %v1871_v55 = vld [vmem:[%s2387_s0 + $0x78] sm:$0xff]  }
 0x7b3   :  { %v440_v57 = vpop.xlane.xlu0 %439 }
 0x7b4   :  { %1903 = vrcp.f32 %v440_v57  ;;  %v1872_v57 = vld [vmem:[%s2387_s0 + $0x80] sm:$0xff]  }
 0x7b7   :  { %v447_v58 = vpop.permute.xlu0 %446 }
 0x7b8   :  { %1733 = vmatpush3.bf16.msra.mxu1 %v447_v58  ;;  %v1873_v58 = vld [vmem:[%s2387_s0 + $0x88] sm:$0xff]  }
 0x7b9   :  { %1738 = vmatprep.subr.bf16.mxu1 %v1969_v1 }
 0x7ba   :  { %v1902_v59 = vpop.eup %1901 }
 0x7bb   :  { %v442_v62 = vmul.f32 %v1902_v59, %v1898_v51  ;;  %v1874_v59 = vld [vmem:[%s2387_s0 + $0x90] sm:$0xff]  }
 0x7be   :  { %v1904_v61 = vpop.eup %1903 }
 0x7bf   :  { %v444_v63 = vmul.f32 %v1904_v61, %v1900_v53  ;;  %v1587_v61 = vld [vmem:[%s2388_s1 + $0x28] ss:$0 sm:$0xff] }
 0x7c1   :  { %v445_v2 = vpack.c.bf16 %v444_v63, %v442_v62 }
 0x7c3   :  { %1735 = vmatmul.mubr.msk.bf16.vlgmr.msra.gmra.mrb[16].mxu1 %vm246_vm2, %v445_v2 }
 0x7c4   :  { %1742 = vmatprep.mubr.msk.bf16.mxu1 %vm1970_vm0, %v1969_v1  ;;  %1739 = vmatpush3.bf16.msra.mxu1 %v1867_v56 }
 0x7c5   :  { %1740 = vmatprep.subr.bf16.mxu1 %v1969_v1 }
 0x7c8   :  { %1741 = vmatpush3.bf16.msra.mxu1 %v1868_v3 }
 0x7c9   :  { %1754 = vmatprep.subr.bf16.mxu1 %v1969_v1 }
 0x896   :  { %v486_v4 = vpop.f32.mrb[16].mxu1 }
 0x897   :  { %v1736_v5 = vpop.f32.mrb[17].mxu1 }
 0x898   :  { %v489_v6 = vpop.f32.mrb[18].mxu1 }
 0x899   :  { %v1846_v7 = vpack.i.bf16 %v489_v6, %v486_v4  ;;  %v1737_v8 = vpop.f32.mrb[19].mxu1 }
 0x89b   :  { %1847 = vrot.lane.b32.xlu1 %v1846_v7, %s1976_s7 }
 0x90d   :  { %v1848_v9 = vpop.permute.xlu1 %1847 }
 0x90e   :  { %v1850_v10 = vunpack.i.h.bf16 %v1848_v9  ;;  %v1849_v11 = vunpack.i.l.bf16 %v1848_v9 }
 0x910   :  { %v502_v12 = vsel %vm246_vm2, %v364_v31, %v1850_v10  ;;  %v501_v13 = vsel %vm246_vm2, %v2129_v29, %v1849_v11 }
 0x911   :  { %v503_v14 = vpack.c.bf16 %v502_v12, %v501_v13 }
 0x913   :  { %1743 = vmatmul.mubr.msk.bf16.vlgmr.msra.gmra.mrb[20].mxu1 %vm132_vm1, %v503_v14 }
 0x914   :  { %1762 = vmatprep.mubr.msk.bf16.mxu1 %vm1970_vm0, %v1969_v1  ;;  %1755 = vmatpush3.bf16.msra.mxu1 %v1871_v55 }
 0x915   :  { %1756 = vmatprep.subr.bf16.mxu1 %v1969_v1 }
 0x918   :  { %1757 = vmatpush3.bf16.msra.mxu1 %v1872_v57 }
 0x919   :  { %1758 = vmatprep.subr.bf16.mxu1 %v1969_v1 }
 0x91c   :  { %1759 = vmatpush3.bf16.msra.mxu1 %v1873_v58  ;;  %v1598_v58 = vld [vmem:[%s2388_s1 + $0x2b] ss:$0 sm:$0xff] }
 0x91d   :  { %1760 = vmatprep.subr.bf16.mxu1 %v1969_v1 }
 0x920   :  { %1761 = vmatpush3.bf16.msra.mxu1 %v1874_v59 }
 0x921   :  { %1780 = vmatprep.subr.bf16.mxu1 %v1969_v1 }
 0x9e6   :  { %v562_v16 = vpop.f32.mrb[20].mxu1 }
 0x9e7   :  { %v563_v17 = vadd.f32 %v1581_v15, %v562_v16  ;;  %v1744_v18 = vpop.f32.mrb[21].mxu1 }
 0x9e8   :  { %v565_v19 = vpop.f32.mrb[22].mxu1 }
 0x9e9   :  { %v566_v20 = vadd.f32 %v1581_v15, %v565_v19  ;;  %v1745_v21 = vpop.f32.mrb[23].mxu1  ;;  %v569_v22 = vadd.f32 %v563_v17, %v2066_v45 }
 0x9eb   :  { %v573_v23 = vsel %vm132_vm1, %v569_v22, 0.0  ;;  %v570_v24 = vadd.f32 %v566_v20, %v2073_v47  ;;  %v1869_v47 = vld [vmem:[%s2387_s0 + $0x68] sm:$0xff]  }
 0x9ec   :  { %574 = vadd.xlane.f32.xlu1 %v573_v23  ;;  %1747 = vmatpush3.bf16.msra.mxu0 %v1869_v47 }
 0x9ed   :  { %v576_v25 = vsel %vm132_vm1, %v570_v24, 0.0  ;;  %1748 = vmatprep.subr.bf16.mxu0 %v1969_v1 }
 0x9ee   :  { %577 = vadd.xlane.f32.xlu0 %v576_v25 }
 0x9f0   :  { %1749 = vmatpush3.bf16.msra.mxu0 %v1870_v35 }
 0x9f1   :  { %1766 = vmatprep.subr.bf16.mxu0 %v1969_v1 }
 0xa79   :  { %v575_v26 = vpop.xlane.xlu1 %574 }
 0xa7a   :  { %v579_v27 = vmul.f32 0.03125, %v575_v26 }
 0xa7b   :  { %v578_v28 = vpop.xlane.xlu0 %577 }
 0xa7c   :  { %v581_v29 = vsub.f32 %v569_v22, %v579_v27  ;;  %v580_v30 = vmul.f32 0.03125, %v578_v28 }
 0xa7e   :  { %v582_v31 = vsub.f32 %v570_v24, %v580_v30  ;;  %v583_v32 = vmul.f32 %v581_v29, %v581_v29  ;;  %v1591_v24 = vld [vmem:[%s2388_s1 + $0x29] ss:$0 sm:$0xff] }
 0xa80   :  { %v585_v33 = vsel %vm132_vm1, %v583_v32, 0.0  ;;  %v584_v34 = vmul.f32 %v582_v31, %v582_v31 }
 0xa81   :  { %586 = vadd.xlane.f32.xlu0 %v585_v33 }
 0xa82   :  { %v588_v45 = vsel %vm132_vm1, %v584_v34, 0.0 }
 0xa83   :  { %589 = vadd.xlane.f32.xlu1 %v588_v45 }
 0xb0e   :  { %v587_v36 = vpop.xlane.xlu0 %586 }
 0xb0f   :  { %v591_v37 = vmul.f32 0.03125, %v587_v36 }
 0xb10   :  { %v590_v38 = vpop.xlane.xlu1 %589 }
 0xb11   :  { %v593_v39 = vadd.f32 1e-12, %v591_v37  ;;  %v592_v40 = vmul.f32 0.03125, %v590_v38 }
 0xb13   :  { %1905 = vrsqrt.f32 %v593_v39  ;;  %v594_v41 = vadd.f32 1e-12, %v592_v40 }
 0xb15   :  { %1907 = vrsqrt.f32 %v594_v41 }
 0xb1d   :  { %v1906_v42 = vpop.eup %1905 }
 0xb1e   :  { %v597_v44 = vmul.f32 %v1906_v42, %v581_v29 }
 0xb1f   :  { %v1908_v46 = vpop.eup %1907 }
 0xb20   :  { %v603_v48 = vmul.f32 %v1585_v43, %v597_v44  ;;  %v598_v49 = vmul.f32 %v1908_v46, %v582_v31  ;;  %v1876_v44 = vld [vmem:[%s2387_s0 + $0xa0] sm:$0xff]  }
 0xb22   :  { %v604_v51 = vmul.f32 %v1585_v43, %v598_v49  ;;  %v609_v52 = vadd.f32 %v1586_v50, %v603_v48  ;;  %v1875_v43 = vld [vmem:[%s2387_s0 + $0x98] sm:$0xff]  }
 0xb24   :  { %v610_v53 = vadd.f32 %v1586_v50, %v604_v51 }
 0xb26   :  { %v611_v54 = vpack.c.bf16 %v610_v53, %v609_v52 }
 0xb28   :  { %1751 = vmatmul.mubr.msk.bf16.vlgmr.msra.gmra.mrb[4].mxu0 %vm132_vm1, %v611_v54  ;;  %v1597_v54 = vld [vmem:[%s2388_s1 + $0x2a] ss:$0 sm:$0xff] }
 0xb29   :  { %1770 = vmatprep.mubr.msk.bf16.mxu0 %vm1970_vm0, %v1969_v1  ;;  %1767 = vmatpush3.bf16.msra.mxu0 %v1875_v43 }
 0xb2a   :  { %1768 = vmatprep.subr.bf16.mxu0 %v1969_v1 }
 0xb2d   :  { %1769 = vmatpush3.bf16.msra.mxu0 %v1876_v44 }
 0xb2e   :  { %1774 = vmatprep.subr.bf16.mxu0 %v1969_v1 }
 0xbfb   :  { %v670_v62 = vpop.f32.mrb[4].mxu0 }
 0xbfc   :  { %v671_v63 = vadd.f32 %v1587_v61, %v670_v62  ;;  %v1752_v2 = vpop.f32.mrb[5].mxu0 }
 0xbfd   :  { %v673_v56 = vpop.f32.mrb[6].mxu0 }
 0xbfe   :  { %v677_v3 = vmul.f32 %v671_v63, %v671_v63  ;;  %v674_v4 = vadd.f32 %v1587_v61, %v673_v56  ;;  %v1753_v5 = vpop.f32.mrb[7].mxu0 }
 0xc00   :  { %v679_v6 = vmul.f32 %v677_v3, %v671_v63  ;;  %v678_v7 = vmul.f32 %v674_v4, %v674_v4  ;;  %v1601_v3 = vld [vmem:[%s2388_s1 + $0x2c] ss:$0 sm:$0xff] }
 0xc02   :  { %v681_v8 = vmul.f32 0.044715, %v679_v6  ;;  %v680_v9 = vmul.f32 %v678_v7, %v674_v4 }
 0xc04   :  { %v683_v10 = vadd.f32 %v681_v8, %v671_v63  ;;  %v682_v11 = vmul.f32 0.044715, %v680_v9 }
 0xc06   :  { %v685_v12 = vmul.f32 0.7978846, %v683_v10  ;;  %v684_v13 = vadd.f32 %v682_v11, %v674_v4 }
 0xc08   :  { %1909 = vtanh.f32 %v685_v12  ;;  %v686_v14 = vmul.f32 0.7978846, %v684_v13 }
 0xc0a   :  { %1911 = vtanh.f32 %v686_v14 }
 0xc12   :  { %v1910_v15 = vpop.eup %1909 }
 0xc13   :  { %v689_v16 = vadd.f32 1.0, %v1910_v15 }
 0xc14   :  { %v1912_v17 = vpop.eup %1911 }
 0xc15   :  { %v691_v18 = vmul.f32 0.5, %v689_v16  ;;  %v690_v19 = vadd.f32 1.0, %v1912_v17 }
 0xc17   :  { %v692_v20 = vmul.f32 0.5, %v690_v19  ;;  %v693_v21 = vmul.f32 %v691_v18, %v671_v63 }
 0xc19   :  { %v694_v22 = vmul.f32 %v692_v20, %v674_v4 }
 0xc1b   :  { %v695_v23 = vpack.c.bf16 %v694_v22, %v693_v21 }
 0xc1d   :  { %1763 = vmatmul.mubr.msk.bf16.vlgmr.msra.gmra.mrb[24].mxu1 %vm733_vm3, %v695_v23 }
 0xc1e   :  { %1782 = vmatprep.mubr.msk.bf16.mxu1 %vm1970_vm0, %v1969_v1 }
 0xcf0   :  { %v771_v25 = vpop.f32.mrb[24].mxu1 }
 0xcf1   :  { %v772_v26 = vadd.f32 %v1591_v24, %v771_v25  ;;  %v1764_v27 = vpop.f32.mrb[25].mxu1 }
 0xcf2   :  { %v774_v28 = vpop.f32.mrb[26].mxu1 }
 0xcf3   :  { %v775_v29 = vadd.f32 %v1591_v24, %v774_v28  ;;  %v1765_v30 = vpop.f32.mrb[27].mxu1  ;;  %v778_v31 = vadd.f32 %v772_v26, %v609_v52 }
 0xcf5   :  { %v782_v32 = vsel %vm132_vm1, %v778_v31, 0.0  ;;  %v779_v33 = vadd.f32 %v775_v29, %v610_v53 }
 0xcf6   :  { %783 = vadd.xlane.f32.xlu0 %v782_v32 }
 0xcf7   :  { %v785_v34 = vsel %vm132_vm1, %v779_v33, 0.0 }
 0xcf8   :  { %786 = vadd.xlane.f32.xlu1 %v785_v34 }
 0xd83   :  { %v784_v45 = vpop.xlane.xlu0 %783 }
 0xd84   :  { %v788_v47 = vmul.f32 0.03125, %v784_v45 }
 0xd85   :  { %v787_v35 = vpop.xlane.xlu1 %786 }
 0xd86   :  { %v790_v36 = vsub.f32 %v778_v31, %v788_v47  ;;  %v789_v37 = vmul.f32 0.03125, %v787_v35 }
 0xd88   :  { %v791_v38 = vsub.f32 %v779_v33, %v789_v37  ;;  %v792_v39 = vmul.f32 %v790_v36, %v790_v36 }
 0xd8a   :  { %v794_v40 = vsel %vm132_vm1, %v792_v39, 0.0  ;;  %v793_v41 = vmul.f32 %v791_v38, %v791_v38 }
 0xd8b   :  { %795 = vadd.xlane.f32.xlu0 %v794_v40 }
 0xd8c   :  { %v797_v42 = vsel %vm132_vm1, %v793_v41, 0.0 }
 0xd8d   :  { %798 = vadd.xlane.f32.xlu1 %v797_v42 }
 0xe18   :  { %v796_v46 = vpop.xlane.xlu0 %795 }
 0xe19   :  { %v800_v48 = vmul.f32 0.03125, %v796_v46 }
 0xe1a   :  { %v799_v49 = vpop.xlane.xlu1 %798 }
 0xe1b   :  { %v802_v50 = vadd.f32 1e-12, %v800_v48  ;;  %v801_v51 = vmul.f32 0.03125, %v799_v49 }
 0xe1d   :  { %1913 = vrsqrt.f32 %v802_v50  ;;  %v803_v52 = vadd.f32 1e-12, %v801_v51 }
 0xe1f   :  { %1915 = vrsqrt.f32 %v803_v52 }
 0xe27   :  { %v1914_v53 = vpop.eup %1913 }
 0xe28   :  { %v806_v55 = vmul.f32 %v1914_v53, %v790_v36 }
 0xe29   :  { %v1916_v57 = vpop.eup %1915 }
 0xe2a   :  { %v812_v59 = vmul.f32 %v1597_v54, %v806_v55  ;;  %v807_v61 = vmul.f32 %v1916_v57, %v791_v38 }
 0xe2c   :  { %v813_v62 = vmul.f32 %v1597_v54, %v807_v61  ;;  %v2227_v63 = vadd.f32 %v1598_v58, %v812_v59 }
 0xe2e   :  { %v2229_v2 = vadd.f32 %v1598_v58, %v813_v62  ;;  %1599 = vst.msk [vmem:[%s2389_s2 + $0x10] sm:$0xff] %vm132_vm1, %v2227_v63 }
 0xe30   :  { %1600 = vst.msk [vmem:[%s2389_s2 + $0x18] sm:$0xff] %vm132_vm1, %v2229_v2  ;;  %v823_v56 = vpack.c.bf16 %v2229_v2, %v2227_v63 }
 0xe32   :  { %1771 = vmatmul.mubr.msk.bf16.vlgmr.msra.gmra.mrb[8].mxu0 %vm132_vm1, %v823_v56 }
 0xe33   :  { %1776 = vmatprep.mubr.msk.bf16.mxu0 %vm1970_vm0, %v1969_v1 }
 0xf05   :  { %v882_v4 = vpop.f32.mrb[8].mxu0 }
 0xf06   :  { %v1772_v5 = vpop.f32.mrb[9].mxu0  ;;  %v883_v7 = vadd.f32 %v1601_v3, %v882_v4 }
 0xf07   :  { %v885_v6 = vpop.f32.mrb[10].mxu0 }
 0xf08   :  { %v886_v8 = vadd.f32 %v1601_v3, %v885_v6  ;;  %v1773_v9 = vpop.f32.mrb[11].mxu0 }
 0xf0a   :  { %v2249_v10 = vpack.c.bf16 %v886_v8, %v883_v7 }
 0xf0c   :  { %1016 = vrot.lane.b32.xlu1 %v2249_v10, %s1972_s22  ;;  %891 = vrot.lane.b32.xlu0 %v2249_v10, %s1971_s21 }
 0xf10   :  { %1014 = vrot.lane.b32.xlu1 %v2249_v10, %s1973_s23 }
 0xf7e   :  { %v892_v11 = vpop.permute.xlu0 %891  ;;  %v1017_v13 = vpop.permute.xlu1 %1016 }
 0xf7f   :  { %v897_v12 = vsel %vm246_vm2, %v892_v11, 0  ;;  %v1022_v14 = vsel %vm246_vm2, %v1017_v13, 0  ;;  %v1877_v11 = vld [vmem:[%s2387_s0 + $0xa8] sm:$0xff]  }
 0xf80   :  { %1775 = vmatpush3.bf16.xpose.msra.mxu0 %v897_v12 }
 0xf81   :  { %1786 = vmatprep.subr.bf16.mxu0 %v1969_v1 }
 0xf82   :  { %v1015_v15 = vpop.permute.xlu1 %1014 }
 0xf87   :  { %1777 = vmatmul.mubr.msk.bf16.vlgmr.msra.gmra.mrb[12].mxu0 %vm246_vm2, %v2249_v10 }
 0xf88   :  { %1787 = vmatpush3.bf16.xpose.msra.mxu0 %v1022_v14  ;;  %1788 = vmatprep.mubr.msk.bf16.mxu0 %vm1970_vm0, %v1969_v1 }
 0xf89   :  { %1798 = vmatprep.subr.bf16.mxu0 %v1969_v1 }
 0xf8f   :  { %1789 = vmatmul.mubr.msk.bf16.vlgmr.msra.gmra.mrb[16].mxu0 %vm246_vm2, %v1015_v15 }
 0xf90   :  { %1802 = vmatprep.mubr.msk.bf16.mxu0 %vm1970_vm0, %v1969_v1  ;;  %1799 = vmatpush3.bf16.msra.mxu0 %v1877_v11 }
 0xf91   :  { %1800 = vmatprep.subr.bf16.mxu0 %v1969_v1 }
0x105a   :  { %v933_v16 = vpop.f32.mrb[12].mxu0 }
0x105b   :  { %v940_v17 = vmul.f32 0.25, %v933_v16  ;;  %v1778_v18 = vpop.f32.mrb[13].mxu0  ;;  %v1878_v16 = vld [vmem:[%s2387_s0 + $0xb0] sm:$0xff]  }
0x105c   :  { %v936_v19 = vpop.f32.mrb[14].mxu0  ;;  %1801 = vmatpush3.bf16.msra.mxu0 %v1878_v16 }
0x105d   :  { %v941_v20 = vmul.f32 0.25, %v936_v19  ;;  %v1779_v21 = vpop.f32.mrb[15].mxu0  ;;  %v942_v22 = vadd.f32 %v940_v17, %v2105_v60  ;;  %1814 = vmatprep.subr.bf16.mxu0 %v1969_v1 }
0x105f   :  { %v944_v23 = vsel %vm246_vm2, %v942_v22, -inf  ;;  %v943_v24 = vadd.f32 %v941_v20, %v2110_v0 }
0x1060   :  { %945 = vmax.xlane.f32.xlu1 %v944_v23 }
0x1061   :  { %v947_v25 = vsel %vm246_vm2, %v943_v24, -inf }
0x1062   :  { %948 = vmax.xlane.f32.xlu0 %v947_v25  ;;  %v1058_v26 = vpop.f32.mrb[16].mxu0 }
0x1063   :  { %v1065_v27 = vmul.f32 0.25, %v1058_v26  ;;  %v1790_v28 = vpop.f32.mrb[17].mxu0 }
0x1064   :  { %v1061_v29 = vpop.f32.mrb[18].mxu0  ;;  %v1609_v28 = vld [vmem:[%s2388_s1 + $0x2d] ss:$0 sm:$0xff] }
0x1065   :  { %v1066_v30 = vmul.f32 0.25, %v1061_v29  ;;  %v1791_v31 = vpop.f32.mrb[19].mxu0  ;;  %v1067_v32 = vadd.f32 %v1065_v27, %v2105_v60 }
0x1067   :  { %v1069_v33 = vsel %vm246_vm2, %v1067_v32, -inf  ;;  %v1068_v34 = vadd.f32 %v1066_v30, %v2110_v0 }
0x1068   :  { %1070 = vmax.xlane.f32.xlu0 %v1069_v33 }
0x1069   :  { %v1072_v45 = vsel %vm246_vm2, %v1068_v34, -inf }
0x106c   :  { %1073 = vmax.xlane.f32.xlu0 %v1072_v45 }
0x10ed   :  { %v946_v47 = vpop.xlane.xlu1 %945 }
0x10ee   :  { %v950_v35 = vsub.f32 %v942_v22, %v946_v47 }
0x10ef   :  { %v949_v36 = vpop.xlane.xlu0 %948 }
0x10f0   :  { %v952_v37 = vmul.f32 1.442695, %v950_v35  ;;  %v951_v38 = vsub.f32 %v943_v24, %v949_v36 }
0x10f2   :  { %1917 = vpow2.f32 %v952_v37  ;;  %v954_v39 = vmul.f32 1.442695, %v951_v38 }
0x10f4   :  { %1919 = vpow2.f32 %v954_v39 }
0x10f5   :  { %v1071_v40 = vpop.xlane.xlu0 %1070 }
0x10f6   :  { %v1075_v41 = vsub.f32 %v1067_v32, %v1071_v40 }
0x10f8   :  { %v1077_v42 = vmul.f32 1.442695, %v1075_v41 }
0x10f9   :  { %v1074_v60 = vpop.xlane.xlu0 %1073 }
0x10fa   :  { %1921 = vpow2.f32 %v1077_v42  ;;  %v1076_v43 = vsub.f32 %v1068_v34, %v1074_v60 }
0x10fc   :  { %v1918_v44 = vpop.eup %1917  ;;  %v1079_v0 = vmul.f32 1.442695, %v1076_v43 }
0x10fd   :  { %v956_v46 = vsel %vm246_vm2, %v1918_v44, 0.0 }
0x10fe   :  { %v1920_v48 = vpop.eup %1919  ;;  %1923 = vpow2.f32 %v1079_v0  ;;  %957 = vadd.xlane.f32.xlu1 %v956_v46  ;;  %v1880_v0 = vld [vmem:[%s2387_s0 + $0xc0] sm:$0xff]  }
0x10ff   :  { %v959_v49 = vsel %vm246_vm2, %v1920_v48, 0.0 }
0x1100   :  { %960 = vadd.xlane.f32.xlu0 %v959_v49 }
0x1104   :  { %v1922_v50 = vpop.eup %1921 }
0x1105   :  { %v1081_v51 = vsel %vm246_vm2, %v1922_v50, 0.0 }
0x1106   :  { %1082 = vadd.xlane.f32.xlu1 %v1081_v51 }
0x1108   :  { %v1924_v52 = vpop.eup %1923 }
0x1109   :  { %v1084_v53 = vsel %vm246_vm2, %v1924_v52, 0.0 }
0x110a   :  { %1085 = vadd.xlane.f32.xlu0 %v1084_v53 }
0x1117   :  { %967 = vrot.lane.b32.xlu1 %v2249_v10, %s1974_s28 }
0x1120   :  { %1092 = vrot.lane.b32.xlu0 %v2249_v10, %s1975_s29 }
0x118b   :  { %v958_v54 = vpop.xlane.xlu1 %957 }
0x118c   :  { %1925 = vrcp.f32 %v958_v54  ;;  %v1613_v54 = vld [vmem:[%s2388_s1 + $0x2e] ss:$0 sm:$0xff] }
0x118d   :  { %v961_v55 = vpop.xlane.xlu0 %960 }
0x118e   :  { %1927 = vrcp.f32 %v961_v55 }
0x1193   :  { %v1083_v57 = vpop.xlane.xlu1 %1082 }
0x1194   :  { %1929 = vrcp.f32 %v1083_v57 }
0x1196   :  { %v1926_v58 = vpop.eup %1925 }
0x1197   :  { %v968_v59 = vpop.permute.xlu1 %967  ;;  %v1086_v61 = vpop.xlane.xlu0 %1085  ;;  %v963_v56 = vmul.f32 %v1926_v58, %v1918_v44 }
0x1198   :  { %v1928_v62 = vpop.eup %1927  ;;  %1931 = vrcp.f32 %v1086_v61  ;;  %1781 = vmatpush3.bf16.msra.mxu1 %v968_v59  ;;  %v1614_v61 = vld [vmem:[%s2388_s1 + $0x2f] ss:$0 sm:$0xff] }
0x1199   :  { %v965_v3 = vmul.f32 %v1928_v62, %v1920_v48  ;;  %1792 = vmatprep.subr.bf16.mxu1 %v1969_v1 }
0x119b   :  { %v1093_v4 = vpop.permute.xlu0 %1092  ;;  %v966_v5 = vpack.c.bf16 %v965_v3, %v963_v56 }
0x119d   :  { %1783 = vmatmul.mubr.msk.bf16.vlgmr.msra.gmra.mrb[28].mxu1 %vm246_vm2, %v966_v5  ;;  %v1881_v5 = vld [vmem:[%s2387_s0 + $0xc8] sm:$0xff]  }
0x119e   :  { %1793 = vmatpush3.bf16.msra.mxu1 %v1093_v4  ;;  %1794 = vmatprep.mubr.msk.bf16.mxu1 %vm1970_vm0, %v1969_v1  ;;  %v1930_v6 = vpop.eup %1929 }
0x119f   :  { %1806 = vmatprep.subr.bf16.mxu1 %v1969_v1  ;;  %v1088_v8 = vmul.f32 %v1930_v6, %v1922_v50  ;;  %v1882_v6 = vld [vmem:[%s2387_s0 + $0xd0] sm:$0xff]  }
0x11a2   :  { %v1932_v7 = vpop.eup %1931 }
0x11a3   :  { %v1090_v9 = vmul.f32 %v1932_v7, %v1924_v52  ;;  %v1883_v7 = vld [vmem:[%s2387_s0 + $0xd8] sm:$0xff]  }
0x11a5   :  { %v1091_v10 = vpack.c.bf16 %v1090_v9, %v1088_v8  ;;  %v1884_v8 = vld [vmem:[%s2387_s0 + $0xe0] sm:$0xff]   ;;  %v1615_v9 = vld [vmem:[%s2388_s1 + $0x30] ss:$0 sm:$0xff] }
0x11a7   :  { %1795 = vmatmul.mubr.msk.bf16.vlgmr.msra.gmra.mrb[32].mxu1 %vm246_vm2, %v1091_v10 }
0x11a8   :  { %1810 = vmatprep.mubr.msk.bf16.mxu1 %vm1970_vm0, %v1969_v1 }
0x1270   :  { %v1007_v12 = vpop.f32.mrb[28].mxu1 }
0x1271   :  { %v1784_v13 = vpop.f32.mrb[29].mxu1 }
0x1272   :  { %v1010_v14 = vpop.f32.mrb[30].mxu1 }
0x1273   :  { %v1785_v15 = vpop.f32.mrb[31].mxu1 }
0x127a   :  { %v1132_v17 = vpop.f32.mrb[32].mxu1 }
0x127b   :  { %v1796_v18 = vpop.f32.mrb[33].mxu1 }
0x127c   :  { %v1135_v19 = vpop.f32.mrb[34].mxu1 }
0x127d   :  { %v1851_v20 = vpack.i.bf16 %v1135_v19, %v1132_v17  ;;  %v1797_v21 = vpop.f32.mrb[35].mxu1 }
0x127f   :  { %1852 = vrot.lane.b32.xlu1 %v1851_v20, %s1976_s7 }
0x12f1   :  { %v1853_v22 = vpop.permute.xlu1 %1852 }
0x12f2   :  { %v1855_v23 = vunpack.i.h.bf16 %v1853_v22  ;;  %v1854_v24 = vunpack.i.l.bf16 %v1853_v22 }
0x12f4   :  { %v1148_v25 = vsel %vm246_vm2, %v1010_v14, %v1855_v23  ;;  %v1147_v26 = vsel %vm246_vm2, %v1007_v12, %v1854_v24 }
0x12f5   :  { %v1149_v27 = vpack.c.bf16 %v1148_v25, %v1147_v26 }
0x12f7   :  { %1803 = vmatmul.mubr.msk.bf16.vlgmr.msra.gmra.mrb[20].mxu0 %vm132_vm1, %v1149_v27 }
0x12f8   :  { %1822 = vmatprep.mubr.msk.bf16.mxu0 %vm1970_vm0, %v1969_v1  ;;  %1815 = vmatpush3.bf16.msra.mxu0 %v1881_v5 }
0x12f9   :  { %1816 = vmatprep.subr.bf16.mxu0 %v1969_v1 }
0x12fc   :  { %1817 = vmatpush3.bf16.msra.mxu0 %v1882_v6 }
0x12fd   :  { %1818 = vmatprep.subr.bf16.mxu0 %v1969_v1 }
0x1300   :  { %1819 = vmatpush3.bf16.msra.mxu0 %v1883_v7 }
0x1301   :  { %1820 = vmatprep.subr.bf16.mxu0 %v1969_v1 }
0x1304   :  { %1821 = vmatpush3.bf16.msra.mxu0 %v1884_v8 }
0x13ca   :  { %v1208_v29 = vpop.f32.mrb[20].mxu0 }
0x13cb   :  { %v1209_v30 = vadd.f32 %v1609_v28, %v1208_v29  ;;  %v1804_v31 = vpop.f32.mrb[21].mxu0 }
0x13cc   :  { %v1211_v32 = vpop.f32.mrb[22].mxu0 }
0x13cd   :  { %v1212_v33 = vadd.f32 %v1609_v28, %v1211_v32  ;;  %v1805_v34 = vpop.f32.mrb[23].mxu0  ;;  %v1215_v45 = vadd.f32 %v1209_v30, %v2227_v63 }
0x13ce   :  { %v1619_v34 = vld [vmem:[%s2388_s1 + $0x31] ss:$0 sm:$0xff] }
0x13cf   :  { %v1219_v47 = vsel %vm132_vm1, %v1215_v45, 0.0  ;;  %v1216_v35 = vadd.f32 %v1212_v33, %v2229_v2  ;;  %v1879_v2 = vld [vmem:[%s2387_s0 + $0xb8] sm:$0xff]  }
0x13d0   :  { %1220 = vadd.xlane.f32.xlu1 %v1219_v47  ;;  %1807 = vmatpush3.bf16.msra.mxu1 %v1879_v2 }
0x13d1   :  { %v1222_v36 = vsel %vm132_vm1, %v1216_v35, 0.0  ;;  %1808 = vmatprep.subr.bf16.mxu1 %v1969_v1 }
0x13d2   :  { %1223 = vadd.xlane.f32.xlu0 %v1222_v36 }
0x13d4   :  { %1809 = vmatpush3.bf16.msra.mxu1 %v1880_v0 }
0x145d   :  { %v1221_v37 = vpop.xlane.xlu1 %1220 }
0x145e   :  { %v1225_v38 = vmul.f32 0.03125, %v1221_v37 }
0x145f   :  { %v1224_v39 = vpop.xlane.xlu0 %1223 }
0x1460   :  { %v1227_v40 = vsub.f32 %v1215_v45, %v1225_v38  ;;  %v1226_v41 = vmul.f32 0.03125, %v1224_v39 }
0x1462   :  { %v1228_v42 = vsub.f32 %v1216_v35, %v1226_v41  ;;  %v1229_v60 = vmul.f32 %v1227_v40, %v1227_v40 }
0x1464   :  { %v1231_v43 = vsel %vm132_vm1, %v1229_v60, 0.0  ;;  %v1230_v44 = vmul.f32 %v1228_v42, %v1228_v42 }
0x1465   :  { %1232 = vadd.xlane.f32.xlu0 %v1231_v43 }
0x1466   :  { %v1234_v63 = vsel %vm132_vm1, %v1230_v44, 0.0 }
0x1467   :  { %1235 = vadd.xlane.f32.xlu1 %v1234_v63 }
0x14f2   :  { %v1233_v46 = vpop.xlane.xlu0 %1232 }
0x14f3   :  { %v1237_v48 = vmul.f32 0.03125, %v1233_v46 }
0x14f4   :  { %v1236_v49 = vpop.xlane.xlu1 %1235 }
0x14f5   :  { %v1239_v50 = vadd.f32 1e-12, %v1237_v48  ;;  %v1238_v51 = vmul.f32 0.03125, %v1236_v49 }
0x14f7   :  { %1933 = vrsqrt.f32 %v1239_v50  ;;  %v1240_v52 = vadd.f32 1e-12, %v1238_v51  ;;  %v1977_v51 = vmov 0.0|0.0  }
0x14f8   :  { %1833 = vmatprep.subr.bf16.mxu1 %v1977_v51 }
0x14f9   :  { %1935 = vrsqrt.f32 %v1240_v52 }
0x1501   :  { %v1934_v53 = vpop.eup %1933 }
0x1502   :  { %v1243_v55 = vmul.f32 %v1934_v53, %v1227_v40 }
0x1503   :  { %v1936_v57 = vpop.eup %1935 }
0x1504   :  { %v1249_v58 = vmul.f32 %v1613_v54, %v1243_v55  ;;  %v1244_v59 = vmul.f32 %v1936_v57, %v1228_v42 }
0x1506   :  { %v1250_v62 = vmul.f32 %v1613_v54, %v1244_v59  ;;  %v1255_v56 = vadd.f32 %v1614_v61, %v1249_v58 }
0x1508   :  { %v1256_v3 = vadd.f32 %v1614_v61, %v1250_v62  ;;  %v1625_v61 = vld [vmem:[%s2388_s1 + $0x32] ss:$0 sm:$0xff] }
0x150a   :  { %v1257_v4 = vpack.c.bf16 %v1256_v3, %v1255_v56 }
0x150c   :  { %1811 = vmatmul.mubr.msk.bf16.vlgmr.msra.gmra.mrb[36].mxu1 %vm132_vm1, %v1257_v4 }
0x150d   :  { %1830 = vmatprep.mubr.msk.f32.mxu1 %vm1970_vm0, %v1969_v1 }
0x15df   :  { %v1316_v10 = vpop.f32.mrb[36].mxu1 }
0x15e0   :  { %v1317_v11 = vadd.f32 %v1615_v9, %v1316_v10  ;;  %v1812_v12 = vpop.f32.mrb[37].mxu1  ;;  %v1468_v10 = vld [vmem:[%s2388_s1 + $0x20] sm:$0x3] }
0x15e1   :  { %v1319_v13 = vpop.f32.mrb[38].mxu1 }
0x15e2   :  { %v1323_v14 = vmul.f32 %v1317_v11, %v1317_v11  ;;  %v1320_v15 = vadd.f32 %v1615_v9, %v1319_v13  ;;  %v1813_v16 = vpop.f32.mrb[39].mxu1 }
0x15e4   :  { %v1325_v17 = vmul.f32 %v1323_v14, %v1317_v11  ;;  %v1324_v18 = vmul.f32 %v1320_v15, %v1320_v15 }
0x15e6   :  { %v1327_v19 = vmul.f32 0.044715, %v1325_v17  ;;  %v1326_v1 = vmul.f32 %v1324_v18, %v1320_v15 }
0x15e8   :  { %v1329_v20 = vadd.f32 %v1327_v19, %v1317_v11  ;;  %v1328_v21 = vmul.f32 0.044715, %v1326_v1 }
0x15ea   :  { %v1331_v22 = vmul.f32 0.7978846, %v1329_v20  ;;  %v1330_v23 = vadd.f32 %v1328_v21, %v1320_v15 }
0x15ec   :  { %1937 = vtanh.f32 %v1331_v22  ;;  %v1332_v24 = vmul.f32 0.7978846, %v1330_v23 }
0x15ee   :  { %1939 = vtanh.f32 %v1332_v24 }
0x15f6   :  { %v1938_v25 = vpop.eup %1937 }
0x15f7   :  { %v1335_v26 = vadd.f32 1.0, %v1938_v25 }
0x15f8   :  { %v1940_v27 = vpop.eup %1939 }
0x15f9   :  { %v1337_v28 = vmul.f32 0.5, %v1335_v26  ;;  %v1336_v29 = vadd.f32 1.0, %v1940_v27 }
0x15fb   :  { %v1338_v30 = vmul.f32 0.5, %v1336_v29  ;;  %v1339_v31 = vmul.f32 %v1337_v28, %v1317_v11 }
0x15fd   :  { %v1340_v32 = vmul.f32 %v1338_v30, %v1320_v15 }
0x15ff   :  { %v1341_v33 = vpack.c.bf16 %v1340_v32, %v1339_v31 }
0x1601   :  { %1823 = vmatmul.mubr.msk.bf16.vlgmr.msra.gmra.mrb[24].mxu0 %vm733_vm3, %v1341_v33 }
0x16d4   :  { %v1416_v45 = vpop.f32.mrb[24].mxu0 }
0x16d5   :  { %v1417_v47 = vadd.f32 %v1619_v34, %v1416_v45  ;;  %v1824_v35 = vpop.f32.mrb[25].mxu0 }
0x16d6   :  { %v1419_v36 = vpop.f32.mrb[26].mxu0 }
0x16d7   :  { %v1420_v37 = vadd.f32 %v1619_v34, %v1419_v36  ;;  %v1825_v38 = vpop.f32.mrb[27].mxu0  ;;  %v1423_v39 = vadd.f32 %v1417_v47, %v1255_v56 }
0x16d9   :  { %v1427_v40 = vsel %vm132_vm1, %v1423_v39, 0.0  ;;  %v1424_v41 = vadd.f32 %v1420_v37, %v1256_v3  ;;  %v1626_v3 = vld [vmem:[%s2388_s1 + $0x33] ss:$0 sm:$0xff] }
0x16da   :  { %1428 = vadd.xlane.f32.xlu0 %v1427_v40 }
0x16db   :  { %v1430_v42 = vsel %vm132_vm1, %v1424_v41, 0.0 }
0x16dc   :  { %1431 = vadd.xlane.f32.xlu1 %v1430_v42 }
0x1767   :  { %v1429_v60 = vpop.xlane.xlu0 %1428 }
0x1768   :  { %v1433_v43 = vmul.f32 0.03125, %v1429_v60 }
0x1769   :  { %v1432_v44 = vpop.xlane.xlu1 %1431 }
0x176a   :  { %v1435_v63 = vsub.f32 %v1423_v39, %v1433_v43  ;;  %v1434_v2 = vmul.f32 0.03125, %v1432_v44 }
0x176c   :  { %v1436_v0 = vsub.f32 %v1424_v41, %v1434_v2  ;;  %v1437_v46 = vmul.f32 %v1435_v63, %v1435_v63 }
0x176e   :  { %v1439_v48 = vsel %vm132_vm1, %v1437_v46, 0.0  ;;  %v1438_v49 = vmul.f32 %v1436_v0, %v1436_v0 }
0x176f   :  { %1440 = vadd.xlane.f32.xlu0 %v1439_v48 }
0x1770   :  { %v1442_v50 = vsel %vm132_vm1, %v1438_v49, 0.0 }
0x1771   :  { %1443 = vadd.xlane.f32.xlu1 %v1442_v50 }
0x17fc   :  { %v1441_v52 = vpop.xlane.xlu0 %1440 }
0x17fd   :  { %v1445_v53 = vmul.f32 0.03125, %v1441_v52 }
0x17fe   :  { %v1444_v54 = vpop.xlane.xlu1 %1443 }
0x17ff   :  { %v1447_v55 = vadd.f32 1e-12, %v1445_v53  ;;  %v1446_v57 = vmul.f32 0.03125, %v1444_v54 }
0x1801   :  { %1941 = vrsqrt.f32 %v1447_v55  ;;  %v1448_v58 = vadd.f32 1e-12, %v1446_v57 }
0x1803   :  { %1943 = vrsqrt.f32 %v1448_v58 }
0x180b   :  { %v1942_v59 = vpop.eup %1941 }
0x180c   :  { %v1451_v62 = vmul.f32 %v1942_v59, %v1435_v63 }
0x180d   :  { %v1944_v56 = vpop.eup %1943 }
0x180e   :  { %v1452_v4 = vmul.f32 %v1944_v56, %v1436_v0  ;;  %v1457_v5 = vmul.f32 %v1625_v61, %v1451_v62 }
0x1810   :  { %v1458_v6 = vmul.f32 %v1625_v61, %v1452_v4  ;;  %v1463_v7 = vadd.f32 %v1626_v3, %v1457_v5 }
0x1812   :  { %v1464_v8 = vadd.f32 %v1626_v3, %v1458_v6  ;;  %1627 = vst.msk [vmem:[%s2389_s2 + $0x20] sm:$0xff] %vm132_vm1, %v1463_v7 }
0x1814   :  { %1628 = vst.msk [vmem:[%s2389_s2 + $0x28] sm:$0xff] %vm132_vm1, %v1464_v8  ;;  %v1834_v9 = vpack.c.bf16 %v1464_v8, %v1463_v7 }
0x1816   :  { %1835 = vmatpush3.bf16.msra.mxu1 %v1834_v9 }
0x1819   :  { %1831 = vmatmul.mubr.msk.f32.vlgmr.msra.gmra.mrb[40].mxu1 %vm246_vm2, %v1468_v10 }
0x18ec   :  { %v1538_v11 = vpop.f32.mrb[40].mxu1 }
0x18ed   :  { %1543 = vst.msk [vmem:[#allocation2] sm:$0x3] %vm1542_vm4, %v1538_v11  ;;  %v1832_v12 = vpop.f32.mrb[41].mxu1 }
0x18ee   :  { %1956 = shalt.err (!%p1953_p4)
}
0x18ef   :  { %s1957_s1 = scalar_lea.hbm %s2390_s3, 32 }
0x18f0   :  { %p1958_p5 = scmp.ne.s32.totalorder %s2390_s3, %s1957_s1  ;;  %p1961_p6 = scmp.lt.u32.totalorder %s1957_s1, %s2390_s3 }
0x18f2   :  { %p1963_p7 = pnand %p1961_p6, %p1958_p5 }
0x18f4   :  { %1966 = shalt.err (!%p1963_p7)
}
0x18f5   :  { %1555 = dma.vmem_to_hbm [thread:$0]  %s1553_s4, 32, %s2390_s3, [#allocation3]  }
0x18f6   :  { %1967 = dma.done.wait [#allocation3], 32  }
0x18f7   :  { %1968 = vsyncadd [#allocation3], 4294967264 }
0x18f8   :  { %1561 = vsyncpa [#allocation3], 1 }

</bundles_post_ra>
